<compile_context>
chip_gen: v5e
topology: v5e:2x2
jax: 0.10.0
libtpu: 0.0.40
codegen_flags: <defaults>
</compile_context>

<pallas_src>
import functools

import jax
import jax.numpy as jnp
from jax import lax
from jax.experimental import pallas as pl
from jax.experimental.pallas import tpu as pltpu


def _round_up(x, m):
    return (x + m - 1) // m * m


def _plan_rows(m, max_tile=256):
    """Pad a row count to a tileable size and pick the row tile (multiple of 8)."""
    if m <= max_tile:
        mp = _round_up(m, 8)
        return mp, mp
    mp = _round_up(m, max_tile)
    return mp, max_tile


def _plan_k(kp):
    if kp <= 512:
        return kp
    for t in (512, 384, 256, 128):
        if kp % t == 0:
            return t
    return 128


def _plan_n(np_):
    if np_ <= 256:
        return np_
    return 256 if np_ % 256 == 0 else 128


# ------------------------------------------------------------------------------------
# Pallas kernels
# ------------------------------------------------------------------------------------
def _gemm_kernel(a_ref, s_ref, t_ref, b_ref, bias_ref, o_ref, acc_ref, *, act, out_act):
    """Tiled GEMM: fused (BN-affine + pre-activation) prologue, bf16 MXU matmul with a
    resident f32 accumulator, fused (bias + sigmoid) epilogue on the last K step."""
    k = pl.program_id(2)

    @pl.when(k == 0)
    def _init():
        acc_ref[...] = jnp.zeros_like(acc_ref)

    # Prologue in f32 on the VPU (v5e has no bf16 VPU), cast to bf16 for the MXU.
    a = a_ref[...].astype(jnp.float32) * s_ref[...] + t_ref[...]
    if act == "leaky_relu":
        a = jnp.maximum(a, 0.2 * a)          # LeakyReLU(0.2)
    elif act == "relu":
        a = jnp.maximum(a, 0.0)
    acc_ref[...] += jnp.dot(a.astype(jnp.bfloat16), b_ref[...],
                            preferred_element_type=jnp.float32)

    @pl.when(k == pl.num_programs(2) - 1)
    def _finalize():
        y = acc_ref[...] + bias_ref[...]
        if out_act == "sigmoid":
            y = 1.0 / (1.0 + jnp.exp(-y))
        o_ref[...] = y.astype(o_ref.dtype)


def _fused_gemm(a_p, scale_k, shift_k, b_p, bias_p, *, act, out_act, tm, tk, tn):
    """a_p: (Mp, Kp) bf16, b_p: (Kp, Np) bf16, scale/shift: (1, Kp) f32, bias: (1, Np) f32."""
    mp, kp = a_p.shape
    np_ = b_p.shape[1]
    grid = (mp // tm, np_ // tn, kp // tk)

    cost = pl.CostEstimate(
        flops=2 * mp * np_ * kp,
        transcendentals=mp * np_ if out_act == "sigmoid" else 0,
        bytes_accessed=a_p.size * 2 + b_p.size * 2 + mp * np_ * 4 + kp * 8 + np_ * 4)

    # Double-buffered inputs/outputs + accumulator scratch, with margin; capped so the
    # same config also fits v7x's 64 MiB physical VMEM.
    vmem = (2 * (tm * tk * 2 + tk * tn * 2 + 2 * tk * 4 + tn * 4)
            + 2 * tm * tn * 4 + tm * tn * 4)
    vmem = int(min(max(2 * vmem, 8 * 1024 * 1024), 32 * 1024 * 1024))

    return pl.pallas_call(
        functools.partial(_gemm_kernel, act=act, out_act=out_act),
        out_shape=jax.ShapeDtypeStruct((mp, np_), jnp.float32),
        grid=grid,
        in_specs=[
            pl.BlockSpec((tm, tk), lambda i, j, k: (i, k)),
            pl.BlockSpec((1, tk), lambda i, j, k: (0, k)),
            pl.BlockSpec((1, tk), lambda i, j, k: (0, k)),
            pl.BlockSpec((tk, tn), lambda i, j, k: (k, j)),
            pl.BlockSpec((1, tn), lambda i, j, k: (0, j)),
        ],
        out_specs=pl.BlockSpec((tm, tn), lambda i, j, k: (i, j)),
        scratch_shapes=[pltpu.VMEM((tm, tn), jnp.float32)],
        compiler_params=pltpu.CompilerParams(
            dimension_semantics=("parallel", "parallel", "arbitrary"),
            vmem_limit_bytes=vmem),
        cost_estimate=cost,
    )(a_p, scale_k, shift_k, b_p, bias_p)


def _bn_sums_kernel(x_ref, s_ref, q_ref):
    """Accumulate per-lane sum and sum-of-squares over the row (grid) axis."""
    @pl.when(pl.program_id(0) == 0)
    def _init():
        s_ref[...] = jnp.zeros_like(s_ref)
        q_ref[...] = jnp.zeros_like(q_ref)

    x = x_ref[...]
    s_ref[...] += jnp.sum(x, axis=0, keepdims=True)
    q_ref[...] += jnp.sum(x * x, axis=0, keepdims=True)


def _bn_scale_shift(data_nhwc, gamma, beta, eps=1e-5):
    """Training-mode BatchNorm2d stats -> per-channel (scale, shift) so that
    BN(x) == x * scale + shift, applied lazily in the consumer GEMM prologue."""
    n, h, w, c = data_nhwc.shape
    m = n * h * w
    # Lane-dense layout: fold whole pixels onto the 128-lane axis when possible so the
    # reduction reads/writes full vregs instead of C(<=32)-wide masked rows.
    lanes = 128 if ((m * c) % 128 == 0 and 128 % c == 0) else c
    x2 = data_nhwc.reshape(-1, lanes)
    rows = x2.shape[0]
    rp, tr = _plan_rows(rows, max_tile=512)
    if rp != rows:
        x2 = jnp.pad(x2, ((0, rp - rows), (0, 0)))   # zero rows do not affect the sums

    cost = pl.CostEstimate(flops=3 * rp * lanes, transcendentals=0,
                           bytes_accessed=rp * lanes * 4 + 2 * lanes * 4)
    ssum, qsum = pl.pallas_call(
        _bn_sums_kernel,
        out_shape=(jax.ShapeDtypeStruct((1, lanes), jnp.float32),
                   jax.ShapeDtypeStruct((1, lanes), jnp.float32)),
        grid=(rp // tr,),
        in_specs=[pl.BlockSpec((tr, lanes), lambda i: (i, 0))],
        out_specs=(pl.BlockSpec((1, lanes), lambda i: (0, 0)),
                   pl.BlockSpec((1, lanes), lambda i: (0, 0))),
        compiler_params=pltpu.CompilerParams(dimension_semantics=("arbitrary",)),
        cost_estimate=cost,
    )(x2)

    # Tiny O(C) finalize in XLA glue.
    s = ssum.reshape(-1, c).sum(axis=0)
    q = qsum.reshape(-1, c).sum(axis=0)
    mean = s / m
    var = jnp.maximum(q / m - mean * mean, 0.0)      # biased variance (train-mode BN)
    scale = gamma * lax.rsqrt(var + eps)
    shift = beta - mean * scale
    return scale, shift


# ------------------------------------------------------------------------------------
# Layer wrappers (lazy activations: (raw NHWC data, per-channel scale, per-channel shift))
# ------------------------------------------------------------------------------------
def _conv_down(x_lazy, layer, *, act):
    """Conv2d(C_in, C_out, kernel_size=4, stride=2, padding=1, bias=False); the module's
    preceding LeakyReLU/ReLU and the lazy BN affine are fused into the GEMM prologue."""
    data, sc, sh = x_lazy
    n, h, w, c = data.shape
    ho, wo = h // 2, w // 2
    m, kk = n * ho * wo, 16 * c
    kp, np_ = layer["w_p"].shape
    cout = layer["cout"]

    xb = jnp.pad(data.astype(jnp.bfloat16), ((0, 0), (1, 1), (1, 1), (0, 0)))
    wins = [xb[:, ky:ky + 2 * ho:2, kx:kx + 2 * wo:2, :]
            for ky in range(4) for kx in range(4)]
    a = jnp.stack(wins, axis=3).reshape(m, kk)              # columns ordered (ky, kx, cin)

    mp, tm = _plan_rows(m)
    a = jnp.pad(a, ((0, mp - m), (0, kp - kk)))
    scale_k = jnp.pad(jnp.tile(sc, 16), (0, kp - kk)).reshape(1, kp).astype(jnp.float32)
    shift_k = jnp.pad(jnp.tile(sh, 16), (0, kp - kk)).reshape(1, kp).astype(jnp.float32)

    out = _fused_gemm(a, scale_k, shift_k, layer["w_p"], layer["bias_p"],
                      act=act, out_act=None, tm=tm, tk=_plan_k(kp), tn=_plan_n(np_))
    out = out[:m, :cout].reshape(n, ho, wo, cout)
    return out, jnp.ones((cout,), jnp.float32), jnp.zeros((cout,), jnp.float32)


_TAP = ((3, 1), (2, 0))   # [output phase][window offset] -> ConvTranspose2d kernel tap


def _conv_transpose_up(x_lazy, layer, *, act, out_act):
    """ConvTranspose2d(C_in, C_out, kernel_size=4, stride=2, padding=1), decomposed into
    its 4 output phases (each a 2x2-tap GEMM over the once-zero-padded input; no
    zero-dilation), with pre-ReLU + lazy BN affine fused in the prologue and
    bias/sigmoid fused in the epilogue."""
    data, sc, sh = x_lazy
    n, h, w, c = data.shape
    m, kk = n * h * w, 4 * c
    kp, np_ = layer["w_p"][0][0].shape
    cout = layer["cout"]

    xb = jnp.pad(data.astype(jnp.bfloat16), ((0, 0), (1, 1), (1, 1), (0, 0)))
    mp, tm = _plan_rows(m)
    scale_k = jnp.pad(jnp.tile(sc, 4), (0, kp - kk)).reshape(1, kp).astype(jnp.float32)
    shift_k = jnp.pad(jnp.tile(sh, 4), (0, kp - kk)).reshape(1, kp).astype(jnp.float32)
    tk, tn = _plan_k(kp), _plan_n(np_)

    phases = []
    for pa in range(2):
        row = []
        for pb in range(2):
            wins = [xb[:, pa + dy:pa + dy + h, pb + dx:pb + dx + w, :]
                    for dy in range(2) for dx in range(2)]
            a = jnp.stack(wins, axis=3).reshape(m, kk)       # columns ordered (dy, dx, cin)
            a = jnp.pad(a, ((0, mp - m), (0, kp - kk)))
            o = _fused_gemm(a, scale_k, shift_k, layer["w_p"][pa][pb], layer["bias_p"],
                            act=act, out_act=out_act, tm=tm, tk=tk, tn=tn)
            row.append(o[:m, :cout].reshape(n, h, w, cout))
        phases.append(row)

    # Interleave the 4 phases back onto the 2x-upsampled grid.
    top = jnp.stack([phases[0][0], phases[0][1]], axis=3)    # (n, h, w, 2, cout)
    bot = jnp.stack([phases[1][0], phases[1][1]], axis=3)
    out = jnp.stack([top, bot], axis=2).reshape(n, 2 * h, 2 * w, cout)
    return out, jnp.ones((cout,), jnp.float32), jnp.zeros((cout,), jnp.float32)


def _bn_lazy(x_lazy, gamma, beta):
    data, _, _ = x_lazy      # BN always directly follows a conv here -> identity affine
    scale, shift = _bn_scale_shift(data, gamma, beta)
    return data, scale, shift


def _concat_lazy(a, b):
    return (jnp.concatenate([a[0], b[0]], axis=-1),
            jnp.concatenate([a[1], b[1]], axis=0),
            jnp.concatenate([a[2], b[2]], axis=0))


# ------------------------------------------------------------------------------------
# Parameters + forward (mirrors the recursive PyTorch module)
# ------------------------------------------------------------------------------------
def init_unet_block(key, outer_nc, inner_nc, input_nc=None, submodule=None,
                    outermost=False, innermost=False, w_scale=0.05):
    """Parameters for one UnetSkipConnectionBlock (norm_layer=BatchNorm2d => use_bias=False
    for every conv except the outermost ConvTranspose2d; use_dropout=False)."""
    if input_nc is None:
        input_nc = outer_nc
    keys = jax.random.split(key, 8)

    def _pack_conv(wc):                       # torch Conv2d layout (cout, cin, 4, 4)
        cout, cin = wc.shape[0], wc.shape[1]
        k, kp, np_ = 16 * cin, _round_up(16 * cin, 128), _round_up(cout, 128)
        mat = wc.transpose(2, 3, 1, 0).reshape(k, cout)       # rows = (ky, kx, cin)
        return (jnp.zeros((kp, np_), jnp.float32).at[:k, :cout].set(mat)
                .astype(jnp.bfloat16))

    def _pack_convT(wt):                      # torch ConvTranspose2d layout (cin, cout, 4, 4)
        cin, cout = wt.shape[0], wt.shape[1]
        k, kp, np_ = 4 * cin, _round_up(4 * cin, 128), _round_up(cout, 128)
        out = []
        for pa in range(2):
            row = []
            for pb in range(2):
                taps = [wt[:, :, _TAP[pa][dy], _TAP[pb][dx]]
                        for dy in range(2) for dx in range(2)]        # each (cin, cout)
                mat = jnp.stack(taps, axis=0).reshape(k, cout)        # rows = (dy, dx, cin)
                row.append(jnp.zeros((kp, np_), jnp.float32)
                           .at[:k, :cout].set(mat).astype(jnp.bfloat16))
            out.append(row)
        return out

    up_in = inner_nc if innermost else inner_nc * 2
    down_w = w_scale * jax.random.normal(keys[0], (inner_nc, input_nc, 4, 4), jnp.float32)
    up_w = w_scale * jax.random.normal(keys[1], (up_in, outer_nc, 4, 4), jnp.float32)

    p = {
        "outermost": outermost, "innermost": innermost, "outer_nc": outer_nc,
        "submodule": submodule,
        "down": {"w_raw": down_w, "w_p": _pack_conv(down_w), "cout": inner_nc,
                 "bias_p": jnp.zeros((1, _round_up(inner_nc, 128)), jnp.float32)},
        "up": {"w_raw": up_w, "w_p": _pack_convT(up_w), "cout": outer_nc,
               "bias_raw": None,
               "bias_p": jnp.zeros((1, _round_up(outer_nc, 128)), jnp.float32)},
        "down_bn": None, "up_bn": None,
    }
    if outermost:
        up_b = 0.01 * jax.random.normal(keys[2], (outer_nc,), jnp.float32)
        p["up"]["bias_raw"] = up_b
        p["up"]["bias_p"] = (jnp.zeros((1, _round_up(outer_nc, 128)), jnp.float32)
                             .at[0, :outer_nc].set(up_b))
    else:
        p["up_bn"] = (1.0 + 0.1 * jax.random.normal(keys[3], (outer_nc,), jnp.float32),
                      0.1 * jax.random.normal(keys[4], (outer_nc,), jnp.float32))
    if not outermost and not innermost:
        p["down_bn"] = (1.0 + 0.1 * jax.random.normal(keys[5], (inner_nc,), jnp.float32),
                        0.1 * jax.random.normal(keys[6], (inner_nc,), jnp.float32))
    return p


def unet_block_apply(p, x_lazy):
    """UnetSkipConnectionBlock.forward on a lazy (data, scale, shift) NHWC activation."""
    if p["outermost"]:
        h = _conv_down(x_lazy, p["down"], act=None)                 # down = [downconv]
        h = unet_block_apply(p["submodule"], h)
        out_act = "sigmoid" if p["outer_nc"] == 3 else None
        return _conv_transpose_up(h, p["up"], act="relu", out_act=out_act)
    if p["innermost"]:
        h = _conv_down(x_lazy, p["down"], act="leaky_relu")         # [LeakyReLU, downconv]
        h = _conv_transpose_up(h, p["up"], act="relu", out_act=None)
        h = _bn_lazy(h, *p["up_bn"])                                # [ReLU, upconv, BN]
        return _concat_lazy(x_lazy, h)                              # cat([x, model(x)], ch)
    h = _conv_down(x_lazy, p["down"], act="leaky_relu")             # [LeakyReLU, downconv, BN]
    h = _bn_lazy(h, *p["down_bn"])
    h = unet_block_apply(p["submodule"], h)
    h = _conv_transpose_up(h, p["up"], act="relu", out_act=None)    # [ReLU, upconv, BN]
    h = _bn_lazy(h, *p["up_bn"])
    return _concat_lazy(x_lazy, h)
    # TODO(synk): use_dropout=True path (nn.Dropout(0.5)) not implemented (default is False).


def unet_forward(params, x_nchw):
    x = jnp.transpose(x_nchw, (0, 2, 3, 1)).astype(jnp.float32)     # NCHW -> NHWC once
    c = x.shape[-1]
    lazy = (x, jnp.ones((c,), jnp.float32), jnp.zeros((c,), jnp.float32))
    out, _, _ = unet_block_apply(params, lazy)
    return jnp.transpose(out, (0, 3, 1, 2))                         # NHWC -> NCHW once


# ------------------------------------------------------------------------------------
# Pure-JAX f32 reference of the same module (for a loose numerical check)
# ------------------------------------------------------------------------------------
def _ref_conv(x, w, stride):
    return lax.conv_general_dilated(x, w, (stride, stride), [(1, 1), (1, 1)],
                                    dimension_numbers=("NCHW", "OIHW", "NCHW"),
                                    precision=lax.Precision.HIGHEST)


def _ref_convT(x, w, bias):
    w_eq = jnp.flip(w, (2, 3)).transpose(1, 0, 2, 3)
    y = lax.conv_general_dilated(x, w_eq, (1, 1), [(2, 2), (2, 2)], lhs_dilation=(2, 2),
                                 dimension_numbers=("NCHW", "OIHW", "NCHW"),
                                 precision=lax.Precision.HIGHEST)
    return y if bias is None else y + bias.reshape(1, -1, 1, 1)


def _ref_bn(x, gamma, beta, eps=1e-5):
    mean = x.mean(axis=(0, 2, 3), keepdims=True)
    var = ((x - mean) ** 2).mean(axis=(0, 2, 3), keepdims=True)
    return (x - mean) * lax.rsqrt(var + eps) * gamma.reshape(1, -1, 1, 1) + beta.reshape(1, -1, 1, 1)


def _ref_block(p, x):
    lrelu = lambda t: jnp.where(t > 0, t, 0.2 * t)
    if p["outermost"]:
        h = _ref_conv(x, p["down"]["w_raw"], 2)
        h = _ref_block(p["submodule"], h)
        h = _ref_convT(jax.nn.relu(h), p["up"]["w_raw"], p["up"]["bias_raw"])
        return jax.nn.sigmoid(h) if p["outer_nc"] == 3 else h
    if p["innermost"]:
        h = _ref_conv(lrelu(x), p["down"]["w_raw"], 2)
        h = _ref_convT(jax.nn.relu(h), p["up"]["w_raw"], None)
        h = _ref_bn(h, *p["up_bn"])
        return jnp.concatenate([x, h], axis=1)
    h = _ref_conv(lrelu(x), p["down"]["w_raw"], 2)
    h = _ref_bn(h, *p["down_bn"])
    h = _ref_block(p["submodule"], h)
    h = _ref_convT(jax.nn.relu(h), p["up"]["w_raw"], None)
    h = _ref_bn(h, *p["up_bn"])
    return jnp.concatenate([x, h], axis=1)


if __name__ == "__main__":
    key = jax.random.PRNGKey(0)
    k_in, k_mid, k_out, k_x = jax.random.split(key, 4)

    N, C, H, W = 2, 3, 16, 16
    ngf = 8
    # Three nested blocks: innermost -> middle -> outermost (outer_nc == 3 -> Sigmoid).
    inner = init_unet_block(k_in, outer_nc=2 * ngf, inner_nc=4 * ngf, innermost=True)
    mid = init_unet_block(k_mid, outer_nc=ngf, inner_nc=2 * ngf, submodule=inner)
    outer = init_unet_block(k_out, outer_nc=C, inner_nc=ngf, input_nc=C,
                            submodule=mid, outermost=True)

    x = jax.random.normal(k_x, (N, C, H, W), jnp.float32)

    fwd = jax.jit(functools.partial(unet_forward, outer))
    out = fwd(x)
    jax.block_until_ready(out)

    assert out.shape == (N, C, H, W), out.shape
    assert out.dtype == jnp.float32
    assert bool(jnp.all(jnp.isfinite(out)))
    assert bool(jnp.all((out > 0.0) & (out < 1.0)))      # outermost sigmoid range

    # Loose check against an f32 XLA reference (bf16 MXU operands in the Pallas path).
    ref = _ref_block(outer, x)
    max_err = float(jnp.max(jnp.abs(out - ref)))
    assert max_err < 0.1, f"max abs diff vs f32 reference: {max_err}"

    print("KERNEL_OK")
</pallas_src>

<mosaic_0001>
module attributes {stable_mosaic.version = 11 : i64} {
  func.func @_gemm_kernel(%arg0: i32, %arg1: i32, %arg2: i32, %arg3: memref<128x128xbf16, #tpu.memory_space<vmem>>, %arg4: memref<1x128xf32, #tpu.memory_space<vmem>>, %arg5: memref<1x128xf32, #tpu.memory_space<vmem>>, %arg6: memref<128x128xbf16, #tpu.memory_space<vmem>>, %arg7: memref<1x128xf32, #tpu.memory_space<vmem>>, %arg8: memref<128x128xf32, #tpu.memory_space<vmem>>, %arg9: memref<128x128xf32, #tpu.memory_space<vmem>>) attributes {dimension_semantics = [#tpu.dimension_semantics<parallel>, #tpu.dimension_semantics<parallel>, #tpu.dimension_semantics<arbitrary>], iteration_bounds = array<i64: 1, 1, 1>, scalar_prefetch = 0 : i64, scratch_operands = 1 : i64, tpu.core_type = #tpu.core_type<tc>, window_params = [{transform_indices = @transform_0, window_bounds = array<i64: 128, 128>}, {transform_indices = @transform_1, window_bounds = array<i64: 1, 128>}, {transform_indices = @transform_2, window_bounds = array<i64: 1, 128>}, {transform_indices = @transform_3, window_bounds = array<i64: 128, 128>}, {transform_indices = @transform_4, window_bounds = array<i64: 1, 128>}, {transform_indices = @transform_5, window_bounds = array<i64: 128, 128>}]} {
    %c0_i32 = arith.constant 0 : i32
    %0 = arith.cmpi eq, %arg2, %c0_i32 : i32
    %1 = arith.extui %0 : i1 to i32
    %c0_i32_0 = arith.constant 0 : i32
    %2 = arith.cmpi ne, %1, %c0_i32_0 : i32
    scf.if %2 {
      %cst_14 = arith.constant 0.000000e+00 : f32
      %20 = vector.broadcast %cst_14 : f32 to vector<128x128xf32>
      %c0_15 = arith.constant 0 : index
      %c0_16 = arith.constant 0 : index
      %21 = vector.load %arg9[%c0_15, %c0_16] : memref<128x128xf32, #tpu.memory_space<vmem>>, vector<128x128xf32>
      tpu.vector_store %arg9[%c0_15, %c0_16], %20 {strides = array<i32>} : memref<128x128xf32, #tpu.memory_space<vmem>>, vector<128x128xf32>,
    } else {
    }
    %c0 = arith.constant 0 : index
    %c0_1 = arith.constant 0 : index
    %3 = vector.load %arg3[%c0, %c0_1] : memref<128x128xbf16, #tpu.memory_space<vmem>>, vector<128x128xbf16>
    %4 = arith.extf %3 : vector<128x128xbf16> to vector<128x128xf32>
    %c0_2 = arith.constant 0 : index
    %c0_3 = arith.constant 0 : index
    %5 = vector.load %arg4[%c0_2, %c0_3] : memref<1x128xf32, #tpu.memory_space<vmem>>, vector<1x128xf32>
    %6 = vector.broadcast %5 : vector<1x128xf32> to vector<128x128xf32>
    %7 = arith.mulf %4, %6 : vector<128x128xf32>
    %c0_4 = arith.constant 0 : index
    %c0_5 = arith.constant 0 : index
    %8 = vector.load %arg5[%c0_4, %c0_5] : memref<1x128xf32, #tpu.memory_space<vmem>>, vector<1x128xf32>
    %9 = vector.broadcast %8 : vector<1x128xf32> to vector<128x128xf32>
    %10 = arith.addf %7, %9 : vector<128x128xf32>
    %c0_6 = arith.constant 0 : index
    %c0_7 = arith.constant 0 : index
    %11 = vector.load %arg9[%c0_6, %c0_7] : memref<128x128xf32, #tpu.memory_space<vmem>>, vector<128x128xf32>
    %12 = arith.truncf %10 : vector<128x128xf32> to vector<128x128xbf16>
    %c0_8 = arith.constant 0 : index
    %c0_9 = arith.constant 0 : index
    %13 = vector.load %arg6[%c0_8, %c0_9] : memref<128x128xbf16, #tpu.memory_space<vmem>>, vector<128x128xbf16>
    %cst = arith.constant dense<0.000000e+00> : vector<128x128xf32>
    %14 = tpu.matmul %12, %13, %cst {dimension_numbers = #tpu.dot_dimension_numbers<[1], [0], [0], [1], [0, 0, 1, 1], [], []>} : vector<128x128xbf16>, vector<128x128xbf16>, vector<128x128xf32> -> vector<128x128xf32>
    %15 = arith.addf %11, %14 : vector<128x128xf32>
    %c0_10 = arith.constant 0 : index
    %c0_11 = arith.constant 0 : index
    %16 = vector.load %arg9[%c0_10, %c0_11] : memref<128x128xf32, #tpu.memory_space<vmem>>, vector<128x128xf32>
    tpu.vector_store %arg9[%c0_10, %c0_11], %15 {strides = array<i32>} : memref<128x128xf32, #tpu.memory_space<vmem>>, vector<128x128xf32>,
    %c0_i32_12 = arith.constant 0 : i32
    %17 = arith.cmpi eq, %arg2, %c0_i32_12 : i32
    %18 = arith.extui %17 : i1 to i32
    %c0_i32_13 = arith.constant 0 : i32
    %19 = arith.cmpi ne, %18, %c0_i32_13 : i32
    scf.if %19 {
      %c0_14 = arith.constant 0 : index
      %c0_15 = arith.constant 0 : index
      %20 = vector.load %arg9[%c0_14, %c0_15] : memref<128x128xf32, #tpu.memory_space<vmem>>, vector<128x128xf32>
      %c0_16 = arith.constant 0 : index
      %c0_17 = arith.constant 0 : index
      %21 = vector.load %arg7[%c0_16, %c0_17] : memref<1x128xf32, #tpu.memory_space<vmem>>, vector<1x128xf32>
      %22 = vector.broadcast %21 : vector<1x128xf32> to vector<128x128xf32>
      %23 = arith.addf %20, %22 : vector<128x128xf32>
      %c0_18 = arith.constant 0 : index
      %c0_19 = arith.constant 0 : index
      %24 = vector.load %arg8[%c0_18, %c0_19] : memref<128x128xf32, #tpu.memory_space<vmem>>, vector<128x128xf32>
      tpu.vector_store %arg8[%c0_18, %c0_19], %23 {strides = array<i32>} : memref<128x128xf32, #tpu.memory_space<vmem>>, vector<128x128xf32>,
    } else {
    }
    return
  }
  func.func @transform_0(%arg0: i32, %arg1: i32, %arg2: i32) -> (i32, i32) {
    %c0_i32 = arith.constant 0 : i32
    return %arg0, %arg2 : i32, i32
  }
  func.func @transform_1(%arg0: i32, %arg1: i32, %arg2: i32) -> (i32, i32) {
    %c0_i32 = arith.constant 0 : i32
    %c0_i32_0 = arith.constant 0 : i32
    return %c0_i32, %arg2 : i32, i32
  }
  func.func @transform_2(%arg0: i32, %arg1: i32, %arg2: i32) -> (i32, i32) {
    %c0_i32 = arith.constant 0 : i32
    %c0_i32_0 = arith.constant 0 : i32
    return %c0_i32, %arg2 : i32, i32
  }
  func.func @transform_3(%arg0: i32, %arg1: i32, %arg2: i32) -> (i32, i32) {
    %c0_i32 = arith.constant 0 : i32
    return %arg2, %arg1 : i32, i32
  }
  func.func @transform_4(%arg0: i32, %arg1: i32, %arg2: i32) -> (i32, i32) {
    %c0_i32 = arith.constant 0 : i32
    %c0_i32_0 = arith.constant 0 : i32
    return %c0_i32, %arg1 : i32, i32
  }
  func.func @transform_5(%arg0: i32, %arg1: i32, %arg2: i32) -> (i32, i32) {
    %c0_i32 = arith.constant 0 : i32
    return %arg0, %arg1 : i32, i32
  }
}

module attributes {stable_mosaic.version = 11 : i64} {
  func.func @_gemm_kernel(%arg0: i32, %arg1: i32, %arg2: i32, %arg3: memref<32x128xbf16, #tpu.memory_space<vmem>>, %arg4: memref<1x128xf32, #tpu.memory_space<vmem>>, %arg5: memref<1x128xf32, #tpu.memory_space<vmem>>, %arg6: memref<128x128xbf16, #tpu.memory_space<vmem>>, %arg7: memref<1x128xf32, #tpu.memory_space<vmem>>, %arg8: memref<32x128xf32, #tpu.memory_space<vmem>>, %arg9: memref<32x128xf32, #tpu.memory_space<vmem>>) attributes {dimension_semantics = [#tpu.dimension_semantics<parallel>, #tpu.dimension_semantics<parallel>, #tpu.dimension_semantics<arbitrary>], iteration_bounds = array<i64: 1, 1, 1>, scalar_prefetch = 0 : i64, scratch_operands = 1 : i64, tpu.core_type = #tpu.core_type<tc>, window_params = [{transform_indices = @transform_0, window_bounds = array<i64: 32, 128>}, {transform_indices = @transform_1, window_bounds = array<i64: 1, 128>}, {transform_indices = @transform_2, window_bounds = array<i64: 1, 128>}, {transform_indices = @transform_3, window_bounds = array<i64: 128, 128>}, {transform_indices = @transform_4, window_bounds = array<i64: 1, 128>}, {transform_indices = @transform_5, window_bounds = array<i64: 32, 128>}]} {
    %c0_i32 = arith.constant 0 : i32
    %0 = arith.cmpi eq, %arg2, %c0_i32 : i32
    %1 = arith.extui %0 : i1 to i32
    %c0_i32_0 = arith.constant 0 : i32
    %2 = arith.cmpi ne, %1, %c0_i32_0 : i32
    scf.if %2 {
      %cst_15 = arith.constant 0.000000e+00 : f32
      %23 = vector.broadcast %cst_15 : f32 to vector<32x128xf32>
      %c0_16 = arith.constant 0 : index
      %c0_17 = arith.constant 0 : index
      %24 = vector.load %arg9[%c0_16, %c0_17] : memref<32x128xf32, #tpu.memory_space<vmem>>, vector<32x128xf32>
      tpu.vector_store %arg9[%c0_16, %c0_17], %23 {strides = array<i32>} : memref<32x128xf32, #tpu.memory_space<vmem>>, vector<32x128xf32>,
    } else {
    }
    %c0 = arith.constant 0 : index
    %c0_1 = arith.constant 0 : index
    %3 = vector.load %arg3[%c0, %c0_1] : memref<32x128xbf16, #tpu.memory_space<vmem>>, vector<32x128xbf16>
    %4 = arith.extf %3 : vector<32x128xbf16> to vector<32x128xf32>
    %c0_2 = arith.constant 0 : index
    %c0_3 = arith.constant 0 : index
    %5 = vector.load %arg4[%c0_2, %c0_3] : memref<1x128xf32, #tpu.memory_space<vmem>>, vector<1x128xf32>
    %6 = vector.broadcast %5 : vector<1x128xf32> to vector<32x128xf32>
    %7 = arith.mulf %4, %6 : vector<32x128xf32>
    %c0_4 = arith.constant 0 : index
    %c0_5 = arith.constant 0 : index
    %8 = vector.load %arg5[%c0_4, %c0_5] : memref<1x128xf32, #tpu.memory_space<vmem>>, vector<1x128xf32>
    %9 = vector.broadcast %8 : vector<1x128xf32> to vector<32x128xf32>
    %10 = arith.addf %7, %9 : vector<32x128xf32>
    %cst = arith.constant 2.000000e-01 : f32
    %11 = vector.broadcast %cst : f32 to vector<32x128xf32>
    %12 = arith.mulf %11, %10 : vector<32x128xf32>
    %13 = arith.maximumf %10, %12 : vector<32x128xf32>
    %c0_6 = arith.constant 0 : index
    %c0_7 = arith.constant 0 : index
    %14 = vector.load %arg9[%c0_6, %c0_7] : memref<32x128xf32, #tpu.memory_space<vmem>>, vector<32x128xf32>
    %15 = arith.truncf %13 : vector<32x128xf32> to vector<32x128xbf16>
    %c0_8 = arith.constant 0 : index
    %c0_9 = arith.constant 0 : index
    %16 = vector.load %arg6[%c0_8, %c0_9] : memref<128x128xbf16, #tpu.memory_space<vmem>>, vector<128x128xbf16>
    %cst_10 = arith.constant dense<0.000000e+00> : vector<32x128xf32>
    %17 = tpu.matmul %15, %16, %cst_10 {dimension_numbers = #tpu.dot_dimension_numbers<[1], [0], [0], [1], [0, 0, 1, 1], [], []>} : vector<32x128xbf16>, vector<128x128xbf16>, vector<32x128xf32> -> vector<32x128xf32>
    %18 = arith.addf %14, %17 : vector<32x128xf32>
    %c0_11 = arith.constant 0 : index
    %c0_12 = arith.constant 0 : index
    %19 = vector.load %arg9[%c0_11, %c0_12] : memref<32x128xf32, #tpu.memory_space<vmem>>, vector<32x128xf32>
    tpu.vector_store %arg9[%c0_11, %c0_12], %18 {strides = array<i32>} : memref<32x128xf32, #tpu.memory_space<vmem>>, vector<32x128xf32>,
    %c0_i32_13 = arith.constant 0 : i32
    %20 = arith.cmpi eq, %arg2, %c0_i32_13 : i32
    %21 = arith.extui %20 : i1 to i32
    %c0_i32_14 = arith.constant 0 : i32
    %22 = arith.cmpi ne, %21, %c0_i32_14 : i32
    scf.if %22 {
      %c0_15 = arith.constant 0 : index
      %c0_16 = arith.constant 0 : index
      %23 = vector.load %arg9[%c0_15, %c0_16] : memref<32x128xf32, #tpu.memory_space<vmem>>, vector<32x128xf32>
      %c0_17 = arith.constant 0 : index
      %c0_18 = arith.constant 0 : index
      %24 = vector.load %arg7[%c0_17, %c0_18] : memref<1x128xf32, #tpu.memory_space<vmem>>, vector<1x128xf32>
      %25 = vector.broadcast %24 : vector<1x128xf32> to vector<32x128xf32>
      %26 = arith.addf %23, %25 : vector<32x128xf32>
      %c0_19 = arith.constant 0 : index
      %c0_20 = arith.constant 0 : index
      %27 = vector.load %arg8[%c0_19, %c0_20] : memref<32x128xf32, #tpu.memory_space<vmem>>, vector<32x128xf32>
      tpu.vector_store %arg8[%c0_19, %c0_20], %26 {strides = array<i32>} : memref<32x128xf32, #tpu.memory_space<vmem>>, vector<32x128xf32>,
    } else {
    }
    return
  }
  func.func @transform_0(%arg0: i32, %arg1: i32, %arg2: i32) -> (i32, i32) {
    %c0_i32 = arith.constant 0 : i32
    return %arg0, %arg2 : i32, i32
  }
  func.func @transform_1(%arg0: i32, %arg1: i32, %arg2: i32) -> (i32, i32) {
    %c0_i32 = arith.constant 0 : i32
    %c0_i32_0 = arith.constant 0 : i32
    return %c0_i32, %arg2 : i32, i32
  }
  func.func @transform_2(%arg0: i32, %arg1: i32, %arg2: i32) -> (i32, i32) {
    %c0_i32 = arith.constant 0 : i32
    %c0_i32_0 = arith.constant 0 : i32
    return %c0_i32, %arg2 : i32, i32
  }
  func.func @transform_3(%arg0: i32, %arg1: i32, %arg2: i32) -> (i32, i32) {
    %c0_i32 = arith.constant 0 : i32
    return %arg2, %arg1 : i32, i32
  }
  func.func @transform_4(%arg0: i32, %arg1: i32, %arg2: i32) -> (i32, i32) {
    %c0_i32 = arith.constant 0 : i32
    %c0_i32_0 = arith.constant 0 : i32
    return %c0_i32, %arg1 : i32, i32
  }
  func.func @transform_5(%arg0: i32, %arg1: i32, %arg2: i32) -> (i32, i32) {
    %c0_i32 = arith.constant 0 : i32
    return %arg0, %arg1 : i32, i32
  }
}

module attributes {stable_mosaic.version = 11 : i64} {
  func.func @_bn_sums_kernel(%arg0: i32, %arg1: memref<8x128xf32, #tpu.memory_space<vmem>>, %arg2: memref<1x128xf32, #tpu.memory_space<vmem>>, %arg3: memref<1x128xf32, #tpu.memory_space<vmem>>) attributes {dimension_semantics = [#tpu.dimension_semantics<arbitrary>], iteration_bounds = array<i64: 1>, scalar_prefetch = 0 : i64, scratch_operands = 0 : i64, tpu.core_type = #tpu.core_type<tc>, window_params = [{transform_indices = @transform_0, window_bounds = array<i64: 8, 128>}, {pipeline_mode = #tpu.pipeline_mode<synchronous>, transform_indices = @transform_1, window_bounds = array<i64: 1, 128>}, {pipeline_mode = #tpu.pipeline_mode<synchronous>, transform_indices = @transform_2, window_bounds = array<i64: 1, 128>}]} {
    %c0_i32 = arith.constant 0 : i32
    %0 = arith.cmpi eq, %arg0, %c0_i32 : i32
    %1 = arith.extui %0 : i1 to i32
    %c0_i32_0 = arith.constant 0 : i32
    %2 = arith.cmpi ne, %1, %c0_i32_0 : i32
    scf.if %2 {
      %cst_11 = arith.constant 0.000000e+00 : f32
      %15 = vector.broadcast %cst_11 : f32 to vector<1x128xf32>
      %c0_12 = arith.constant 0 : index
      %c0_13 = arith.constant 0 : index
      %16 = vector.load %arg2[%c0_12, %c0_13] : memref<1x128xf32, #tpu.memory_space<vmem>>, vector<1x128xf32>
      tpu.vector_store %arg2[%c0_12, %c0_13], %15 {strides = array<i32>} : memref<1x128xf32, #tpu.memory_space<vmem>>, vector<1x128xf32>,
      %cst_14 = arith.constant 0.000000e+00 : f32
      %17 = vector.broadcast %cst_14 : f32 to vector<1x128xf32>
      %c0_15 = arith.constant 0 : index
      %c0_16 = arith.constant 0 : index
      %18 = vector.load %arg3[%c0_15, %c0_16] : memref<1x128xf32, #tpu.memory_space<vmem>>, vector<1x128xf32>
      tpu.vector_store %arg3[%c0_15, %c0_16], %17 {strides = array<i32>} : memref<1x128xf32, #tpu.memory_space<vmem>>, vector<1x128xf32>,
    } else {
    }
    %c0 = arith.constant 0 : index
    %c0_1 = arith.constant 0 : index
    %3 = vector.load %arg1[%c0, %c0_1] : memref<8x128xf32, #tpu.memory_space<vmem>>, vector<8x128xf32>
    %c0_2 = arith.constant 0 : index
    %c0_3 = arith.constant 0 : index
    %4 = vector.load %arg2[%c0_2, %c0_3] : memref<1x128xf32, #tpu.memory_space<vmem>>, vector<1x128xf32>
    %cst = arith.constant dense<0.000000e+00> : vector<128xf32>
    %5 = vector.multi_reduction <add>, %3, %cst [0] : vector<8x128xf32> to vector<128xf32>
    %6 = vector.shape_cast %5 : vector<128xf32> to vector<1x128xf32>
    %7 = arith.addf %4, %6 : vector<1x128xf32>
    %c0_4 = arith.constant 0 : index
    %c0_5 = arith.constant 0 : index
    %8 = vector.load %arg2[%c0_4, %c0_5] : memref<1x128xf32, #tpu.memory_space<vmem>>, vector<1x128xf32>
    tpu.vector_store %arg2[%c0_4, %c0_5], %7 {strides = array<i32>} : memref<1x128xf32, #tpu.memory_space<vmem>>, vector<1x128xf32>,
    %c0_6 = arith.constant 0 : index
    %c0_7 = arith.constant 0 : index
    %9 = vector.load %arg3[%c0_6, %c0_7] : memref<1x128xf32, #tpu.memory_space<vmem>>, vector<1x128xf32>
    %10 = arith.mulf %3, %3 : vector<8x128xf32>
    %cst_8 = arith.constant dense<0.000000e+00> : vector<128xf32>
    %11 = vector.multi_reduction <add>, %10, %cst_8 [0] : vector<8x128xf32> to vector<128xf32>
    %12 = vector.shape_cast %11 : vector<128xf32> to vector<1x128xf32>
    %13 = arith.addf %9, %12 : vector<1x128xf32>
    %c0_9 = arith.constant 0 : index
    %c0_10 = arith.constant 0 : index
    %14 = vector.load %arg3[%c0_9, %c0_10] : memref<1x128xf32, #tpu.memory_space<vmem>>, vector<1x128xf32>
    tpu.vector_store %arg3[%c0_9, %c0_10], %13 {strides = array<i32>} : memref<1x128xf32, #tpu.memory_space<vmem>>, vector<1x128xf32>,
    return
  }
  func.func @transform_0(%arg0: i32) -> (i32, i32) {
    %c0_i32 = arith.constant 0 : i32
    %c0_i32_0 = arith.constant 0 : i32
    return %arg0, %c0_i32 : i32, i32
  }
  func.func @transform_1(%arg0: i32) -> (i32, i32) {
    %c0_i32 = arith.constant 0 : i32
    %c0_i32_0 = arith.constant 0 : i32
    %c0_i32_1 = arith.constant 0 : i32
    return %c0_i32, %c0_i32_0 : i32, i32
  }
  func.func @transform_2(%arg0: i32) -> (i32, i32) {
    %c0_i32 = arith.constant 0 : i32
    %c0_i32_0 = arith.constant 0 : i32
    %c0_i32_1 = arith.constant 0 : i32
    return %c0_i32, %c0_i32_0 : i32, i32
  }
}

module attributes {stable_mosaic.version = 11 : i64} {
  func.func @_gemm_kernel(%arg0: i32, %arg1: i32, %arg2: i32, %arg3: memref<8x256xbf16, #tpu.memory_space<vmem>>, %arg4: memref<1x256xf32, #tpu.memory_space<vmem>>, %arg5: memref<1x256xf32, #tpu.memory_space<vmem>>, %arg6: memref<256x128xbf16, #tpu.memory_space<vmem>>, %arg7: memref<1x128xf32, #tpu.memory_space<vmem>>, %arg8: memref<8x128xf32, #tpu.memory_space<vmem>>, %arg9: memref<8x128xf32, #tpu.memory_space<vmem>>) attributes {dimension_semantics = [#tpu.dimension_semantics<parallel>, #tpu.dimension_semantics<parallel>, #tpu.dimension_semantics<arbitrary>], iteration_bounds = array<i64: 1, 1, 1>, scalar_prefetch = 0 : i64, scratch_operands = 1 : i64, tpu.core_type = #tpu.core_type<tc>, window_params = [{transform_indices = @transform_0, window_bounds = array<i64: 8, 256>}, {transform_indices = @transform_1, window_bounds = array<i64: 1, 256>}, {transform_indices = @transform_2, window_bounds = array<i64: 1, 256>}, {transform_indices = @transform_3, window_bounds = array<i64: 256, 128>}, {transform_indices = @transform_4, window_bounds = array<i64: 1, 128>}, {transform_indices = @transform_5, window_bounds = array<i64: 8, 128>}]} {
    %c0_i32 = arith.constant 0 : i32
    %0 = arith.cmpi eq, %arg2, %c0_i32 : i32
    %1 = arith.extui %0 : i1 to i32
    %c0_i32_0 = arith.constant 0 : i32
    %2 = arith.cmpi ne, %1, %c0_i32_0 : i32
    scf.if %2 {
      %cst_15 = arith.constant 0.000000e+00 : f32
      %23 = vector.broadcast %cst_15 : f32 to vector<8x128xf32>
      %c0_16 = arith.constant 0 : index
      %c0_17 = arith.constant 0 : index
      %24 = vector.load %arg9[%c0_16, %c0_17] : memref<8x128xf32, #tpu.memory_space<vmem>>, vector<8x128xf32>
      tpu.vector_store %arg9[%c0_16, %c0_17], %23 {strides = array<i32>} : memref<8x128xf32, #tpu.memory_space<vmem>>, vector<8x128xf32>,
    } else {
    }
    %c0 = arith.constant 0 : index
    %c0_1 = arith.constant 0 : index
    %3 = vector.load %arg3[%c0, %c0_1] : memref<8x256xbf16, #tpu.memory_space<vmem>>, vector<8x256xbf16>
    %4 = arith.extf %3 : vector<8x256xbf16> to vector<8x256xf32>
    %c0_2 = arith.constant 0 : index
    %c0_3 = arith.constant 0 : index
    %5 = vector.load %arg4[%c0_2, %c0_3] : memref<1x256xf32, #tpu.memory_space<vmem>>, vector<1x256xf32>
    %6 = vector.broadcast %5 : vector<1x256xf32> to vector<8x256xf32>
    %7 = arith.mulf %4, %6 : vector<8x256xf32>
    %c0_4 = arith.constant 0 : index
    %c0_5 = arith.constant 0 : index
    %8 = vector.load %arg5[%c0_4, %c0_5] : memref<1x256xf32, #tpu.memory_space<vmem>>, vector<1x256xf32>
    %9 = vector.broadcast %8 : vector<1x256xf32> to vector<8x256xf32>
    %10 = arith.addf %7, %9 : vector<8x256xf32>
    %cst = arith.constant 2.000000e-01 : f32
    %11 = vector.broadcast %cst : f32 to vector<8x256xf32>
    %12 = arith.mulf %11, %10 : vector<8x256xf32>
    %13 = arith.maximumf %10, %12 : vector<8x256xf32>
    %c0_6 = arith.constant 0 : index
    %c0_7 = arith.constant 0 : index
    %14 = vector.load %arg9[%c0_6, %c0_7] : memref<8x128xf32, #tpu.memory_space<vmem>>, vector<8x128xf32>
    %15 = arith.truncf %13 : vector<8x256xf32> to vector<8x256xbf16>
    %c0_8 = arith.constant 0 : index
    %c0_9 = arith.constant 0 : index
    %16 = vector.load %arg6[%c0_8, %c0_9] : memref<256x128xbf16, #tpu.memory_space<vmem>>, vector<256x128xbf16>
    %cst_10 = arith.constant dense<0.000000e+00> : vector<8x128xf32>
    %17 = tpu.matmul %15, %16, %cst_10 {dimension_numbers = #tpu.dot_dimension_numbers<[1], [0], [0], [1], [0, 0, 1, 1], [], []>} : vector<8x256xbf16>, vector<256x128xbf16>, vector<8x128xf32> -> vector<8x128xf32>
    %18 = arith.addf %14, %17 : vector<8x128xf32>
    %c0_11 = arith.constant 0 : index
    %c0_12 = arith.constant 0 : index
    %19 = vector.load %arg9[%c0_11, %c0_12] : memref<8x128xf32, #tpu.memory_space<vmem>>, vector<8x128xf32>
    tpu.vector_store %arg9[%c0_11, %c0_12], %18 {strides = array<i32>} : memref<8x128xf32, #tpu.memory_space<vmem>>, vector<8x128xf32>,
    %c0_i32_13 = arith.constant 0 : i32
    %20 = arith.cmpi eq, %arg2, %c0_i32_13 : i32
    %21 = arith.extui %20 : i1 to i32
    %c0_i32_14 = arith.constant 0 : i32
    %22 = arith.cmpi ne, %21, %c0_i32_14 : i32
    scf.if %22 {
      %c0_15 = arith.constant 0 : index
      %c0_16 = arith.constant 0 : index
      %23 = vector.load %arg9[%c0_15, %c0_16] : memref<8x128xf32, #tpu.memory_space<vmem>>, vector<8x128xf32>
      %c0_17 = arith.constant 0 : index
      %c0_18 = arith.constant 0 : index
      %24 = vector.load %arg7[%c0_17, %c0_18] : memref<1x128xf32, #tpu.memory_space<vmem>>, vector<1x128xf32>
      %25 = vector.broadcast %24 : vector<1x128xf32> to vector<8x128xf32>
      %26 = arith.addf %23, %25 : vector<8x128xf32>
      %c0_19 = arith.constant 0 : index
      %c0_20 = arith.constant 0 : index
      %27 = vector.load %arg8[%c0_19, %c0_20] : memref<8x128xf32, #tpu.memory_space<vmem>>, vector<8x128xf32>
      tpu.vector_store %arg8[%c0_19, %c0_20], %26 {strides = array<i32>} : memref<8x128xf32, #tpu.memory_space<vmem>>, vector<8x128xf32>,
    } else {
    }
    return
  }
  func.func @transform_0(%arg0: i32, %arg1: i32, %arg2: i32) -> (i32, i32) {
    %c0_i32 = arith.constant 0 : i32
    return %arg0, %arg2 : i32, i32
  }
  func.func @transform_1(%arg0: i32, %arg1: i32, %arg2: i32) -> (i32, i32) {
    %c0_i32 = arith.constant 0 : i32
    %c0_i32_0 = arith.constant 0 : i32
    return %c0_i32, %arg2 : i32, i32
  }
  func.func @transform_2(%arg0: i32, %arg1: i32, %arg2: i32) -> (i32, i32) {
    %c0_i32 = arith.constant 0 : i32
    %c0_i32_0 = arith.constant 0 : i32
    return %c0_i32, %arg2 : i32, i32
  }
  func.func @transform_3(%arg0: i32, %arg1: i32, %arg2: i32) -> (i32, i32) {
    %c0_i32 = arith.constant 0 : i32
    return %arg2, %arg1 : i32, i32
  }
  func.func @transform_4(%arg0: i32, %arg1: i32, %arg2: i32) -> (i32, i32) {
    %c0_i32 = arith.constant 0 : i32
    %c0_i32_0 = arith.constant 0 : i32
    return %c0_i32, %arg1 : i32, i32
  }
  func.func @transform_5(%arg0: i32, %arg1: i32, %arg2: i32) -> (i32, i32) {
    %c0_i32 = arith.constant 0 : i32
    return %arg0, %arg1 : i32, i32
  }
}

module attributes {stable_mosaic.version = 11 : i64} {
  func.func @_gemm_kernel(%arg0: i32, %arg1: i32, %arg2: i32, %arg3: memref<8x128xbf16, #tpu.memory_space<vmem>>, %arg4: memref<1x128xf32, #tpu.memory_space<vmem>>, %arg5: memref<1x128xf32, #tpu.memory_space<vmem>>, %arg6: memref<128x128xbf16, #tpu.memory_space<vmem>>, %arg7: memref<1x128xf32, #tpu.memory_space<vmem>>, %arg8: memref<8x128xf32, #tpu.memory_space<vmem>>, %arg9: memref<8x128xf32, #tpu.memory_space<vmem>>) attributes {dimension_semantics = [#tpu.dimension_semantics<parallel>, #tpu.dimension_semantics<parallel>, #tpu.dimension_semantics<arbitrary>], iteration_bounds = array<i64: 1, 1, 1>, scalar_prefetch = 0 : i64, scratch_operands = 1 : i64, tpu.core_type = #tpu.core_type<tc>, window_params = [{transform_indices = @transform_0, window_bounds = array<i64: 8, 128>}, {transform_indices = @transform_1, window_bounds = array<i64: 1, 128>}, {transform_indices = @transform_2, window_bounds = array<i64: 1, 128>}, {transform_indices = @transform_3, window_bounds = array<i64: 128, 128>}, {transform_indices = @transform_4, window_bounds = array<i64: 1, 128>}, {transform_indices = @transform_5, window_bounds = array<i64: 8, 128>}]} {
    %c0_i32 = arith.constant 0 : i32
    %0 = arith.cmpi eq, %arg2, %c0_i32 : i32
    %1 = arith.extui %0 : i1 to i32
    %c0_i32_0 = arith.constant 0 : i32
    %2 = arith.cmpi ne, %1, %c0_i32_0 : i32
    scf.if %2 {
      %cst_15 = arith.constant 0.000000e+00 : f32
      %22 = vector.broadcast %cst_15 : f32 to vector<8x128xf32>
      %c0_16 = arith.constant 0 : index
      %c0_17 = arith.constant 0 : index
      %23 = vector.load %arg9[%c0_16, %c0_17] : memref<8x128xf32, #tpu.memory_space<vmem>>, vector<8x128xf32>
      tpu.vector_store %arg9[%c0_16, %c0_17], %22 {strides = array<i32>} : memref<8x128xf32, #tpu.memory_space<vmem>>, vector<8x128xf32>,
    } else {
    }
    %c0 = arith.constant 0 : index
    %c0_1 = arith.constant 0 : index
    %3 = vector.load %arg3[%c0, %c0_1] : memref<8x128xbf16, #tpu.memory_space<vmem>>, vector<8x128xbf16>
    %4 = arith.extf %3 : vector<8x128xbf16> to vector<8x128xf32>
    %c0_2 = arith.constant 0 : index
    %c0_3 = arith.constant 0 : index
    %5 = vector.load %arg4[%c0_2, %c0_3] : memref<1x128xf32, #tpu.memory_space<vmem>>, vector<1x128xf32>
    %6 = vector.broadcast %5 : vector<1x128xf32> to vector<8x128xf32>
    %7 = arith.mulf %4, %6 : vector<8x128xf32>
    %c0_4 = arith.constant 0 : index
    %c0_5 = arith.constant 0 : index
    %8 = vector.load %arg5[%c0_4, %c0_5] : memref<1x128xf32, #tpu.memory_space<vmem>>, vector<1x128xf32>
    %9 = vector.broadcast %8 : vector<1x128xf32> to vector<8x128xf32>
    %10 = arith.addf %7, %9 : vector<8x128xf32>
    %cst = arith.constant 0.000000e+00 : f32
    %11 = vector.broadcast %cst : f32 to vector<8x128xf32>
    %12 = arith.maximumf %10, %11 : vector<8x128xf32>
    %c0_6 = arith.constant 0 : index
    %c0_7 = arith.constant 0 : index
    %13 = vector.load %arg9[%c0_6, %c0_7] : memref<8x128xf32, #tpu.memory_space<vmem>>, vector<8x128xf32>
    %14 = arith.truncf %12 : vector<8x128xf32> to vector<8x128xbf16>
    %c0_8 = arith.constant 0 : index
    %c0_9 = arith.constant 0 : index
    %15 = vector.load %arg6[%c0_8, %c0_9] : memref<128x128xbf16, #tpu.memory_space<vmem>>, vector<128x128xbf16>
    %cst_10 = arith.constant dense<0.000000e+00> : vector<8x128xf32>
    %16 = tpu.matmul %14, %15, %cst_10 {dimension_numbers = #tpu.dot_dimension_numbers<[1], [0], [0], [1], [0, 0, 1, 1], [], []>} : vector<8x128xbf16>, vector<128x128xbf16>, vector<8x128xf32> -> vector<8x128xf32>
    %17 = arith.addf %13, %16 : vector<8x128xf32>
    %c0_11 = arith.constant 0 : index
    %c0_12 = arith.constant 0 : index
    %18 = vector.load %arg9[%c0_11, %c0_12] : memref<8x128xf32, #tpu.memory_space<vmem>>, vector<8x128xf32>
    tpu.vector_store %arg9[%c0_11, %c0_12], %17 {strides = array<i32>} : memref<8x128xf32, #tpu.memory_space<vmem>>, vector<8x128xf32>,
    %c0_i32_13 = arith.constant 0 : i32
    %19 = arith.cmpi eq, %arg2, %c0_i32_13 : i32
    %20 = arith.extui %19 : i1 to i32
    %c0_i32_14 = arith.constant 0 : i32
    %21 = arith.cmpi ne, %20, %c0_i32_14 : i32
    scf.if %21 {
      %c0_15 = arith.constant 0 : index
      %c0_16 = arith.constant 0 : index
      %22 = vector.load %arg9[%c0_15, %c0_16] : memref<8x128xf32, #tpu.memory_space<vmem>>, vector<8x128xf32>
      %c0_17 = arith.constant 0 : index
      %c0_18 = arith.constant 0 : index
      %23 = vector.load %arg7[%c0_17, %c0_18] : memref<1x128xf32, #tpu.memory_space<vmem>>, vector<1x128xf32>
      %24 = vector.broadcast %23 : vector<1x128xf32> to vector<8x128xf32>
      %25 = arith.addf %22, %24 : vector<8x128xf32>
      %c0_19 = arith.constant 0 : index
      %c0_20 = arith.constant 0 : index
      %26 = vector.load %arg8[%c0_19, %c0_20] : memref<8x128xf32, #tpu.memory_space<vmem>>, vector<8x128xf32>
      tpu.vector_store %arg8[%c0_19, %c0_20], %25 {strides = array<i32>} : memref<8x128xf32, #tpu.memory_space<vmem>>, vector<8x128xf32>,
    } else {
    }
    return
  }
  func.func @transform_0(%arg0: i32, %arg1: i32, %arg2: i32) -> (i32, i32) {
    %c0_i32 = arith.constant 0 : i32
    return %arg0, %arg2 : i32, i32
  }
  func.func @transform_1(%arg0: i32, %arg1: i32, %arg2: i32) -> (i32, i32) {
    %c0_i32 = arith.constant 0 : i32
    %c0_i32_0 = arith.constant 0 : i32
    return %c0_i32, %arg2 : i32, i32
  }
  func.func @transform_2(%arg0: i32, %arg1: i32, %arg2: i32) -> (i32, i32) {
    %c0_i32 = arith.constant 0 : i32
    %c0_i32_0 = arith.constant 0 : i32
    return %c0_i32, %arg2 : i32, i32
  }
  func.func @transform_3(%arg0: i32, %arg1: i32, %arg2: i32) -> (i32, i32) {
    %c0_i32 = arith.constant 0 : i32
    return %arg2, %arg1 : i32, i32
  }
  func.func @transform_4(%arg0: i32, %arg1: i32, %arg2: i32) -> (i32, i32) {
    %c0_i32 = arith.constant 0 : i32
    %c0_i32_0 = arith.constant 0 : i32
    return %c0_i32, %arg1 : i32, i32
  }
  func.func @transform_5(%arg0: i32, %arg1: i32, %arg2: i32) -> (i32, i32) {
    %c0_i32 = arith.constant 0 : i32
    return %arg0, %arg1 : i32, i32
  }
}

module attributes {stable_mosaic.version = 11 : i64} {
  func.func @_gemm_kernel(%arg0: i32, %arg1: i32, %arg2: i32, %arg3: memref<32x128xbf16, #tpu.memory_space<vmem>>, %arg4: memref<1x128xf32, #tpu.memory_space<vmem>>, %arg5: memref<1x128xf32, #tpu.memory_space<vmem>>, %arg6: memref<128x128xbf16, #tpu.memory_space<vmem>>, %arg7: memref<1x128xf32, #tpu.memory_space<vmem>>, %arg8: memref<32x128xf32, #tpu.memory_space<vmem>>, %arg9: memref<32x128xf32, #tpu.memory_space<vmem>>) attributes {dimension_semantics = [#tpu.dimension_semantics<parallel>, #tpu.dimension_semantics<parallel>, #tpu.dimension_semantics<arbitrary>], iteration_bounds = array<i64: 1, 1, 1>, scalar_prefetch = 0 : i64, scratch_operands = 1 : i64, tpu.core_type = #tpu.core_type<tc>, window_params = [{transform_indices = @transform_0, window_bounds = array<i64: 32, 128>}, {transform_indices = @transform_1, window_bounds = array<i64: 1, 128>}, {transform_indices = @transform_2, window_bounds = array<i64: 1, 128>}, {transform_indices = @transform_3, window_bounds = array<i64: 128, 128>}, {transform_indices = @transform_4, window_bounds = array<i64: 1, 128>}, {transform_indices = @transform_5, window_bounds = array<i64: 32, 128>}]} {
    %c0_i32 = arith.constant 0 : i32
    %0 = arith.cmpi eq, %arg2, %c0_i32 : i32
    %1 = arith.extui %0 : i1 to i32
    %c0_i32_0 = arith.constant 0 : i32
    %2 = arith.cmpi ne, %1, %c0_i32_0 : i32
    scf.if %2 {
      %cst_15 = arith.constant 0.000000e+00 : f32
      %22 = vector.broadcast %cst_15 : f32 to vector<32x128xf32>
      %c0_16 = arith.constant 0 : index
      %c0_17 = arith.constant 0 : index
      %23 = vector.load %arg9[%c0_16, %c0_17] : memref<32x128xf32, #tpu.memory_space<vmem>>, vector<32x128xf32>
      tpu.vector_store %arg9[%c0_16, %c0_17], %22 {strides = array<i32>} : memref<32x128xf32, #tpu.memory_space<vmem>>, vector<32x128xf32>,
    } else {
    }
    %c0 = arith.constant 0 : index
    %c0_1 = arith.constant 0 : index
    %3 = vector.load %arg3[%c0, %c0_1] : memref<32x128xbf16, #tpu.memory_space<vmem>>, vector<32x128xbf16>
    %4 = arith.extf %3 : vector<32x128xbf16> to vector<32x128xf32>
    %c0_2 = arith.constant 0 : index
    %c0_3 = arith.constant 0 : index
    %5 = vector.load %arg4[%c0_2, %c0_3] : memref<1x128xf32, #tpu.memory_space<vmem>>, vector<1x128xf32>
    %6 = vector.broadcast %5 : vector<1x128xf32> to vector<32x128xf32>
    %7 = arith.mulf %4, %6 : vector<32x128xf32>
    %c0_4 = arith.constant 0 : index
    %c0_5 = arith.constant 0 : index
    %8 = vector.load %arg5[%c0_4, %c0_5] : memref<1x128xf32, #tpu.memory_space<vmem>>, vector<1x128xf32>
    %9 = vector.broadcast %8 : vector<1x128xf32> to vector<32x128xf32>
    %10 = arith.addf %7, %9 : vector<32x128xf32>
    %cst = arith.constant 0.000000e+00 : f32
    %11 = vector.broadcast %cst : f32 to vector<32x128xf32>
    %12 = arith.maximumf %10, %11 : vector<32x128xf32>
    %c0_6 = arith.constant 0 : index
    %c0_7 = arith.constant 0 : index
    %13 = vector.load %arg9[%c0_6, %c0_7] : memref<32x128xf32, #tpu.memory_space<vmem>>, vector<32x128xf32>
    %14 = arith.truncf %12 : vector<32x128xf32> to vector<32x128xbf16>
    %c0_8 = arith.constant 0 : index
    %c0_9 = arith.constant 0 : index
    %15 = vector.load %arg6[%c0_8, %c0_9] : memref<128x128xbf16, #tpu.memory_space<vmem>>, vector<128x128xbf16>
    %cst_10 = arith.constant dense<0.000000e+00> : vector<32x128xf32>
    %16 = tpu.matmul %14, %15, %cst_10 {dimension_numbers = #tpu.dot_dimension_numbers<[1], [0], [0], [1], [0, 0, 1, 1], [], []>} : vector<32x128xbf16>, vector<128x128xbf16>, vector<32x128xf32> -> vector<32x128xf32>
    %17 = arith.addf %13, %16 : vector<32x128xf32>
    %c0_11 = arith.constant 0 : index
    %c0_12 = arith.constant 0 : index
    %18 = vector.load %arg9[%c0_11, %c0_12] : memref<32x128xf32, #tpu.memory_space<vmem>>, vector<32x128xf32>
    tpu.vector_store %arg9[%c0_11, %c0_12], %17 {strides = array<i32>} : memref<32x128xf32, #tpu.memory_space<vmem>>, vector<32x128xf32>,
    %c0_i32_13 = arith.constant 0 : i32
    %19 = arith.cmpi eq, %arg2, %c0_i32_13 : i32
    %20 = arith.extui %19 : i1 to i32
    %c0_i32_14 = arith.constant 0 : i32
    %21 = arith.cmpi ne, %20, %c0_i32_14 : i32
    scf.if %21 {
      %c0_15 = arith.constant 0 : index
      %c0_16 = arith.constant 0 : index
      %22 = vector.load %arg9[%c0_15, %c0_16] : memref<32x128xf32, #tpu.memory_space<vmem>>, vector<32x128xf32>
      %c0_17 = arith.constant 0 : index
      %c0_18 = arith.constant 0 : index
      %23 = vector.load %arg7[%c0_17, %c0_18] : memref<1x128xf32, #tpu.memory_space<vmem>>, vector<1x128xf32>
      %24 = vector.broadcast %23 : vector<1x128xf32> to vector<32x128xf32>
      %25 = arith.addf %22, %24 : vector<32x128xf32>
      %c0_19 = arith.constant 0 : index
      %c0_20 = arith.constant 0 : index
      %26 = vector.load %arg8[%c0_19, %c0_20] : memref<32x128xf32, #tpu.memory_space<vmem>>, vector<32x128xf32>
      tpu.vector_store %arg8[%c0_19, %c0_20], %25 {strides = array<i32>} : memref<32x128xf32, #tpu.memory_space<vmem>>, vector<32x128xf32>,
    } else {
    }
    return
  }
  func.func @transform_0(%arg0: i32, %arg1: i32, %arg2: i32) -> (i32, i32) {
    %c0_i32 = arith.constant 0 : i32
    return %arg0, %arg2 : i32, i32
  }
  func.func @transform_1(%arg0: i32, %arg1: i32, %arg2: i32) -> (i32, i32) {
    %c0_i32 = arith.constant 0 : i32
    %c0_i32_0 = arith.constant 0 : i32
    return %c0_i32, %arg2 : i32, i32
  }
  func.func @transform_2(%arg0: i32, %arg1: i32, %arg2: i32) -> (i32, i32) {
    %c0_i32 = arith.constant 0 : i32
    %c0_i32_0 = arith.constant 0 : i32
    return %c0_i32, %arg2 : i32, i32
  }
  func.func @transform_3(%arg0: i32, %arg1: i32, %arg2: i32) -> (i32, i32) {
    %c0_i32 = arith.constant 0 : i32
    return %arg2, %arg1 : i32, i32
  }
  func.func @transform_4(%arg0: i32, %arg1: i32, %arg2: i32) -> (i32, i32) {
    %c0_i32 = arith.constant 0 : i32
    %c0_i32_0 = arith.constant 0 : i32
    return %c0_i32, %arg1 : i32, i32
  }
  func.func @transform_5(%arg0: i32, %arg1: i32, %arg2: i32) -> (i32, i32) {
    %c0_i32 = arith.constant 0 : i32
    return %arg0, %arg1 : i32, i32
  }
}

module attributes {stable_mosaic.version = 11 : i64} {
  func.func @_gemm_kernel(%arg0: i32, %arg1: i32, %arg2: i32, %arg3: memref<128x128xbf16, #tpu.memory_space<vmem>>, %arg4: memref<1x128xf32, #tpu.memory_space<vmem>>, %arg5: memref<1x128xf32, #tpu.memory_space<vmem>>, %arg6: memref<128x128xbf16, #tpu.memory_space<vmem>>, %arg7: memref<1x128xf32, #tpu.memory_space<vmem>>, %arg8: memref<128x128xf32, #tpu.memory_space<vmem>>, %arg9: memref<128x128xf32, #tpu.memory_space<vmem>>) attributes {dimension_semantics = [#tpu.dimension_semantics<parallel>, #tpu.dimension_semantics<parallel>, #tpu.dimension_semantics<arbitrary>], iteration_bounds = array<i64: 1, 1, 1>, scalar_prefetch = 0 : i64, scratch_operands = 1 : i64, tpu.core_type = #tpu.core_type<tc>, window_params = [{transform_indices = @transform_0, window_bounds = array<i64: 128, 128>}, {transform_indices = @transform_1, window_bounds = array<i64: 1, 128>}, {transform_indices = @transform_2, window_bounds = array<i64: 1, 128>}, {transform_indices = @transform_3, window_bounds = array<i64: 128, 128>}, {transform_indices = @transform_4, window_bounds = array<i64: 1, 128>}, {transform_indices = @transform_5, window_bounds = array<i64: 128, 128>}]} {
    %c0_i32 = arith.constant 0 : i32
    %0 = arith.cmpi eq, %arg2, %c0_i32 : i32
    %1 = arith.extui %0 : i1 to i32
    %c0_i32_0 = arith.constant 0 : i32
    %2 = arith.cmpi ne, %1, %c0_i32_0 : i32
    scf.if %2 {
      %cst_15 = arith.constant 0.000000e+00 : f32
      %22 = vector.broadcast %cst_15 : f32 to vector<128x128xf32>
      %c0_16 = arith.constant 0 : index
      %c0_17 = arith.constant 0 : index
      %23 = vector.load %arg9[%c0_16, %c0_17] : memref<128x128xf32, #tpu.memory_space<vmem>>, vector<128x128xf32>
      tpu.vector_store %arg9[%c0_16, %c0_17], %22 {strides = array<i32>} : memref<128x128xf32, #tpu.memory_space<vmem>>, vector<128x128xf32>,
    } else {
    }
    %c0 = arith.constant 0 : index
    %c0_1 = arith.constant 0 : index
    %3 = vector.load %arg3[%c0, %c0_1] : memref<128x128xbf16, #tpu.memory_space<vmem>>, vector<128x128xbf16>
    %4 = arith.extf %3 : vector<128x128xbf16> to vector<128x128xf32>
    %c0_2 = arith.constant 0 : index
    %c0_3 = arith.constant 0 : index
    %5 = vector.load %arg4[%c0_2, %c0_3] : memref<1x128xf32, #tpu.memory_space<vmem>>, vector<1x128xf32>
    %6 = vector.broadcast %5 : vector<1x128xf32> to vector<128x128xf32>
    %7 = arith.mulf %4, %6 : vector<128x128xf32>
    %c0_4 = arith.constant 0 : index
    %c0_5 = arith.constant 0 : index
    %8 = vector.load %arg5[%c0_4, %c0_5] : memref<1x128xf32, #tpu.memory_space<vmem>>, vector<1x128xf32>
    %9 = vector.broadcast %8 : vector<1x128xf32> to vector<128x128xf32>
    %10 = arith.addf %7, %9 : vector<128x128xf32>
    %cst = arith.constant 0.000000e+00 : f32
    %11 = vector.broadcast %cst : f32 to vector<128x128xf32>
    %12 = arith.maximumf %10, %11 : vector<128x128xf32>
    %c0_6 = arith.constant 0 : index
    %c0_7 = arith.constant 0 : index
    %13 = vector.load %arg9[%c0_6, %c0_7] : memref<128x128xf32, #tpu.memory_space<vmem>>, vector<128x128xf32>
    %14 = arith.truncf %12 : vector<128x128xf32> to vector<128x128xbf16>
    %c0_8 = arith.constant 0 : index
    %c0_9 = arith.constant 0 : index
    %15 = vector.load %arg6[%c0_8, %c0_9] : memref<128x128xbf16, #tpu.memory_space<vmem>>, vector<128x128xbf16>
    %cst_10 = arith.constant dense<0.000000e+00> : vector<128x128xf32>
    %16 = tpu.matmul %14, %15, %cst_10 {dimension_numbers = #tpu.dot_dimension_numbers<[1], [0], [0], [1], [0, 0, 1, 1], [], []>} : vector<128x128xbf16>, vector<128x128xbf16>, vector<128x128xf32> -> vector<128x128xf32>
    %17 = arith.addf %13, %16 : vector<128x128xf32>
    %c0_11 = arith.constant 0 : index
    %c0_12 = arith.constant 0 : index
    %18 = vector.load %arg9[%c0_11, %c0_12] : memref<128x128xf32, #tpu.memory_space<vmem>>, vector<128x128xf32>
    tpu.vector_store %arg9[%c0_11, %c0_12], %17 {strides = array<i32>} : memref<128x128xf32, #tpu.memory_space<vmem>>, vector<128x128xf32>,
    %c0_i32_13 = arith.constant 0 : i32
    %19 = arith.cmpi eq, %arg2, %c0_i32_13 : i32
    %20 = arith.extui %19 : i1 to i32
    %c0_i32_14 = arith.constant 0 : i32
    %21 = arith.cmpi ne, %20, %c0_i32_14 : i32
    scf.if %21 {
      %c0_15 = arith.constant 0 : index
      %c0_16 = arith.constant 0 : index
      %22 = vector.load %arg9[%c0_15, %c0_16] : memref<128x128xf32, #tpu.memory_space<vmem>>, vector<128x128xf32>
      %c0_17 = arith.constant 0 : index
      %c0_18 = arith.constant 0 : index
      %23 = vector.load %arg7[%c0_17, %c0_18] : memref<1x128xf32, #tpu.memory_space<vmem>>, vector<1x128xf32>
      %24 = vector.broadcast %23 : vector<1x128xf32> to vector<128x128xf32>
      %25 = arith.addf %22, %24 : vector<128x128xf32>
      %cst_19 = arith.constant 0.000000e+00 : f32
      %26 = vector.broadcast %cst_19 : f32 to vector<128x128xf32>
      %27 = arith.subf %26, %25 : vector<128x128xf32>
      %28 = math.exp %27 : vector<128x128xf32>
      %cst_20 = arith.constant 1.000000e+00 : f32
      %29 = vector.broadcast %cst_20 : f32 to vector<128x128xf32>
      %30 = arith.addf %29, %28 : vector<128x128xf32>
      %cst_21 = arith.constant 1.000000e+00 : f32
      %31 = vector.broadcast %cst_21 : f32 to vector<128x128xf32>
      %32 = arith.divf %31, %30 : vector<128x128xf32>
      %c0_22 = arith.constant 0 : index
      %c0_23 = arith.constant 0 : index
      %33 = vector.load %arg8[%c0_22, %c0_23] : memref<128x128xf32, #tpu.memory_space<vmem>>, vector<128x128xf32>
      tpu.vector_store %arg8[%c0_22, %c0_23], %32 {strides = array<i32>} : memref<128x128xf32, #tpu.memory_space<vmem>>, vector<128x128xf32>,
    } else {
    }
    return
  }
  func.func @transform_0(%arg0: i32, %arg1: i32, %arg2: i32) -> (i32, i32) {
    %c0_i32 = arith.constant 0 : i32
    return %arg0, %arg2 : i32, i32
  }
  func.func @transform_1(%arg0: i32, %arg1: i32, %arg2: i32) -> (i32, i32) {
    %c0_i32 = arith.constant 0 : i32
    %c0_i32_0 = arith.constant 0 : i32
    return %c0_i32, %arg2 : i32, i32
  }
  func.func @transform_2(%arg0: i32, %arg1: i32, %arg2: i32) -> (i32, i32) {
    %c0_i32 = arith.constant 0 : i32
    %c0_i32_0 = arith.constant 0 : i32
    return %c0_i32, %arg2 : i32, i32
  }
  func.func @transform_3(%arg0: i32, %arg1: i32, %arg2: i32) -> (i32, i32) {
    %c0_i32 = arith.constant 0 : i32
    return %arg2, %arg1 : i32, i32
  }
  func.func @transform_4(%arg0: i32, %arg1: i32, %arg2: i32) -> (i32, i32) {
    %c0_i32 = arith.constant 0 : i32
    %c0_i32_0 = arith.constant 0 : i32
    return %c0_i32, %arg1 : i32, i32
  }
  func.func @transform_5(%arg0: i32, %arg1: i32, %arg2: i32) -> (i32, i32) {
    %c0_i32 = arith.constant 0 : i32
    return %arg0, %arg1 : i32, i32
  }
}

</mosaic_0001>

<bundles_post_ra>
// kernel: tile.32
= control target key start
LH: loop header
LB: loop body
LE: loop exit
PB: predicated region body
PF: predicated region fallthrough
CT: control target
= control target key end

     0   :  { %s20_s0 = inlined_call_operand.<no memory space> [shape: f32[], index: 0, kind: input, shape index: {}]   ;;  %s21_s1 = inlined_call_operand.vmem [shape: f32[48], index: 1, kind: output, shape index: {}]  }
   0x1   :  { %v2_v0 = vstv %s20_s0 }
   0x2   :  { %3 = vst [vmem:[%s21_s1] sm:$0x1] %v2_v0 }

// kernel: unet_forward.18
= control target key start
LH: loop header
LB: loop body
LE: loop exit
PB: predicated region body
PF: predicated region fallthrough
CT: control target
= control target key end

     0   :  { %s617_s3 = inlined_call_operand.vmem [shape: bf16[128,128], index: 3, kind: input, shape index: {}]   ;;  %s618_s1 = inlined_call_operand.vmem [shape: f32[1,128], index: 1, kind: input, shape index: {}]   ;;  %s619_s2 = inlined_call_operand.vmem [shape: f32[1,128], index: 2, kind: input, shape index: {}]   ;;  %s620_s4 = inlined_call_operand.vmem [shape: f32[1,128], index: 4, kind: input, shape index: {}]   ;;  %s621_s0 = inlined_call_operand.vmem [shape: bf16[128,128], index: 0, kind: input, shape index: {}]   ;;  %s622_s5 = inlined_call_operand.vmem [shape: f32[128,128], index: 5, kind: output, shape index: {}]  }
   0x1   :  { %v379_v0 = vld [vmem:[%s617_s3 + $0x38] sm:$0xff]  ;;  %v378_v1 = vld [vmem:[%s617_s3 + $0x30] sm:$0xff]  ;;  %v377_v2 = vld [vmem:[%s617_s3 + $0x28] sm:$0xff] }
   0x2   :  { %200 = vmatpush.bf16.msra.mxu0 %v379_v0  ;;  %419 = vmatpush.bf16.msra.mxu1 %v379_v0  ;;  %v376_v3 = vld [vmem:[%s617_s3 + $0x20] sm:$0xff]  ;;  %v375_v5 = vld [vmem:[%s617_s3 + $0x18] sm:$0xff]  ;;  %v413_v6 = vld [vmem:[%s621_s0 + $0x10] sm:$0xff]  }
   0x3   :  { %420 = vmatpush.bf16.msra.mxu2 %v379_v0  ;;  %421 = vmatpush.bf16.msra.mxu3 %v379_v0  ;;  %v381_v4 = vld [vmem:[%s621_s0] sm:$0xff]   ;;  %v417_v8 = vld [vmem:[%s621_s0 + $0x30] sm:$0xff]   ;;  %v390_v12 = vunpack.c.l.bf16 %v413_v6  ;;  %v391_v13 = vunpack.c.h.bf16 %v413_v6  ;;  %v373_v25 = vld [vmem:[%s617_s3 + $0x8] sm:$0xff] }
   0x4   :  { %v415_v7 = vld [vmem:[%s621_s0 + $0x20] sm:$0xff]   ;;  %v382_v9 = vunpack.c.l.bf16 %v381_v4  ;;  %v383_v11 = vunpack.c.h.bf16 %v381_v4  ;;  %v374_v15 = vld [vmem:[%s617_s3 + $0x10] sm:$0xff]  ;;  %v406_v17 = vunpack.c.l.bf16 %v417_v8  ;;  %v407_v18 = vunpack.c.h.bf16 %v417_v8  ;;  %v412_v42 = vld [vmem:[%s621_s0 + $0x8] sm:$0xff]  }
   0x5   :  { %v506_v10 = vld [vmem:[%s618_s1] ss:$0 sm:$0xff]  ;;  %v398_v14 = vunpack.c.l.bf16 %v415_v7  ;;  %v399_v16 = vunpack.c.h.bf16 %v415_v7  ;;  %v414_v43 = vld [vmem:[%s621_s0 + $0x18] sm:$0xff]   ;;  %v416_v44 = vld [vmem:[%s621_s0 + $0x28] sm:$0xff]   ;;  %v386_v46 = vunpack.c.l.bf16 %v412_v42  ;;  %v387_v47 = vunpack.c.h.bf16 %v412_v42 }
   0x6   :  { %201 = vmatpush.bf16.msra.mxu0 %v378_v1  ;;  %422 = vmatpush.bf16.msra.mxu1 %v378_v1  ;;  %v76_v19 = vmul.f32 %v506_v10, %v382_v9  ;;  %v515_v20 = vld [vmem:[%s619_s2] ss:$0 sm:$0xff]  ;;  %v77_v21 = vmul.f32 %v506_v10, %v383_v11  ;;  %v80_v22 = vmul.f32 %v506_v10, %v390_v12  ;;  %v418_v45 = vld [vmem:[%s621_s0 + $0x38] sm:$0xff]   ;;  %v394_v48 = vunpack.c.l.bf16 %v414_v43 }
   0x7   :  { %423 = vmatpush.bf16.msra.mxu2 %v378_v1  ;;  %424 = vmatpush.bf16.msra.mxu3 %v378_v1  ;;  %v81_v23 = vmul.f32 %v506_v10, %v391_v13  ;;  %v84_v24 = vmul.f32 %v506_v10, %v398_v14  ;;  %v85_v26 = vmul.f32 %v506_v10, %v399_v16  ;;  %v372_v34 = vld [vmem:[%s617_s3] sm:$0xff]  ;;  %v395_v49 = vunpack.c.h.bf16 %v414_v43 }
   0x8   :  { %v88_v27 = vmul.f32 %v506_v10, %v406_v17  ;;  %v89_v28 = vmul.f32 %v506_v10, %v407_v18  ;;  %v96_v29 = vadd.f32 %v515_v20, %v76_v19  ;;  %v97_v30 = vadd.f32 %v515_v20, %v77_v21 }
   0x9   :  { %v100_v31 = vadd.f32 %v515_v20, %v80_v22  ;;  %v101_v32 = vadd.f32 %v515_v20, %v81_v23  ;;  %v104_v33 = vadd.f32 %v515_v20, %v84_v24  ;;  %v105_v35 = vadd.f32 %v515_v20, %v85_v26 }
   0xa   :  { %202 = vmatpush.bf16.msra.mxu0 %v377_v2  ;;  %425 = vmatpush.bf16.msra.mxu1 %v377_v2  ;;  %v108_v36 = vadd.f32 %v515_v20, %v88_v27  ;;  %v109_v37 = vadd.f32 %v515_v20, %v89_v28  ;;  %v128_v38 = vpack.c.bf16 %v97_v30, %v96_v29  ;;  %v402_v50 = vunpack.c.l.bf16 %v416_v44 }
   0xb   :  { %426 = vmatpush.bf16.msra.mxu2 %v377_v2  ;;  %427 = vmatpush.bf16.msra.mxu3 %v377_v2  ;;  %v130_v39 = vpack.c.bf16 %v101_v32, %v100_v31  ;;  %v132_v40 = vpack.c.bf16 %v105_v35, %v104_v33  ;;  %v403_v51 = vunpack.c.h.bf16 %v416_v44  ;;  %v410_v52 = vunpack.c.l.bf16 %v418_v45 }
   0xc   :  { %v134_v41 = vpack.c.bf16 %v109_v37, %v108_v36  ;;  %v411_v53 = vunpack.c.h.bf16 %v418_v45  ;;  %v78_v54 = vmul.f32 %v506_v10, %v386_v46  ;;  %v79_v55 = vmul.f32 %v506_v10, %v387_v47 }
   0xd   :  { %v82_v56 = vmul.f32 %v506_v10, %v394_v48  ;;  %v83_v57 = vmul.f32 %v506_v10, %v395_v49  ;;  %v86_v58 = vmul.f32 %v506_v10, %v402_v50  ;;  %v87_v59 = vmul.f32 %v506_v10, %v403_v51 }
   0xe   :  { %203 = vmatpush.bf16.msra.mxu0 %v376_v3  ;;  %428 = vmatpush.bf16.msra.mxu1 %v376_v3  ;;  %v90_v60 = vmul.f32 %v506_v10, %v410_v52  ;;  %v91_v61 = vmul.f32 %v506_v10, %v411_v53  ;;  %v98_v62 = vadd.f32 %v515_v20, %v78_v54  ;;  %v445_v10 = vld [vmem:[%s620_s4] ss:$0 sm:$0xff] }
   0xf   :  { %429 = vmatpush.bf16.msra.mxu2 %v376_v3  ;;  %430 = vmatpush.bf16.msra.mxu3 %v376_v3  ;;  %v99_v63 = vadd.f32 %v515_v20, %v79_v55  ;;  %v102_v0 = vadd.f32 %v515_v20, %v82_v56  ;;  %v103_v1 = vadd.f32 %v515_v20, %v83_v57 }
  0x10   :  { %v106_v2 = vadd.f32 %v515_v20, %v86_v58  ;;  %v107_v3 = vadd.f32 %v515_v20, %v87_v59  ;;  %v110_v4 = vadd.f32 %v515_v20, %v90_v60 }
  0x11   :  { %v129_v6 = vpack.c.bf16 %v99_v63, %v98_v62  ;;  %v131_v7 = vpack.c.bf16 %v103_v1, %v102_v0 }
  0x12   :  { %204 = vmatpush.bf16.msra.mxu0 %v375_v5  ;;  %431 = vmatpush.bf16.msra.mxu1 %v375_v5  ;;  %v133_v8 = vpack.c.bf16 %v107_v3, %v106_v2 }
  0x13   :  { %432 = vmatpush.bf16.msra.mxu2 %v375_v5  ;;  %433 = vmatpush.bf16.msra.mxu3 %v375_v5  ;;  %v111_v5 = vadd.f32 %v515_v20, %v91_v61 }
  0x15   :  { %v135_v9 = vpack.c.bf16 %v111_v5, %v110_v4 }
  0x16   :  { %205 = vmatpush.bf16.msra.mxu0 %v374_v15  ;;  %434 = vmatpush.bf16.msra.mxu1 %v374_v15 }
  0x17   :  { %435 = vmatpush.bf16.msra.mxu2 %v374_v15  ;;  %436 = vmatpush.bf16.msra.mxu3 %v374_v15 }
  0x1a   :  { %206 = vmatpush.bf16.msra.mxu0 %v373_v25  ;;  %437 = vmatpush.bf16.msra.mxu1 %v373_v25 }
  0x1b   :  { %438 = vmatpush.bf16.msra.mxu2 %v373_v25  ;;  %439 = vmatpush.bf16.msra.mxu3 %v373_v25 }
  0x1e   :  { %207 = vmatpush.bf16.msra.mxu0 %v372_v34  ;;  %440 = vmatpush.bf16.msra.mxu1 %v372_v34 }
  0x1f   :  { %441 = vmatpush.bf16.msra.mxu2 %v372_v34  ;;  %442 = vmatpush.bf16.msra.mxu3 %v372_v34 }
  0x21   :  { %208 = vmatmul.bf16.vlgmr.msra.gmra.mxu0 %v128_v38  ;;  %218 = vmatmul.bf16.vlgmr.msra.gmra.mxu1 %v130_v39 }
  0x22   :  { %228 = vmatmul.bf16.vlgmr.msra.gmra.mxu2 %v132_v40  ;;  %238 = vmatmul.bf16.vlgmr.msra.gmra.mxu3 %v134_v41 }
  0x31   :  { %213 = vmatmul.bf16.gmra.mxu0 %v129_v6  ;;  %223 = vmatmul.bf16.gmra.mxu1 %v131_v7 }
  0x32   :  { %233 = vmatmul.bf16.gmra.mxu2 %v133_v8  ;;  %243 = vmatmul.bf16.gmra.mxu3 %v135_v9 }
  0x9e   :  { %v209_v11 = vpop.f32.mrf.mxu0  ;;  %v219_v12 = vpop.f32.mrf.mxu1 }
  0x9f   :  { %v304_v13 = vadd.f32 %v445_v10, %v209_v11  ;;  %v308_v14 = vadd.f32 %v445_v10, %v219_v12 }
  0xa1   :  { %320 = vst [vmem:[%s622_s5] sm:$0xff] %v304_v13 }
  0xa2   :  { %324 = vst [vmem:[%s622_s5 + $0x20] sm:$0xff] %v308_v14 }
  0xa5   :  { %v229_v15 = vpop.f32.mrf.mxu2  ;;  %v239_v16 = vpop.f32.mrf.mxu3 }
  0xa6   :  { %v312_v17 = vadd.f32 %v445_v10, %v229_v15  ;;  %v316_v18 = vadd.f32 %v445_v10, %v239_v16  ;;  %v211_v19 = vpop.f32.mrf.mxu0  ;;  %v221_v20 = vpop.f32.mrf.mxu1 }
  0xa7   :  { %v305_v21 = vadd.f32 %v445_v10, %v211_v19  ;;  %v309_v22 = vadd.f32 %v445_v10, %v221_v20 }
  0xa8   :  { %328 = vst [vmem:[%s622_s5 + $0x40] sm:$0xff] %v312_v17 }
  0xa9   :  { %332 = vst [vmem:[%s622_s5 + $0x60] sm:$0xff] %v316_v18 }
  0xaa   :  { %321 = vst [vmem:[%s622_s5 + $0x8] sm:$0xff] %v305_v21 }
  0xab   :  { %325 = vst [vmem:[%s622_s5 + $0x28] sm:$0xff] %v309_v22 }
  0xad   :  { %v231_v23 = vpop.f32.mrf.mxu2  ;;  %v241_v24 = vpop.f32.mrf.mxu3 }
  0xae   :  { %v313_v25 = vadd.f32 %v445_v10, %v231_v23  ;;  %v317_v26 = vadd.f32 %v445_v10, %v241_v24  ;;  %v214_v27 = vpop.f32.mrf.mxu0  ;;  %v224_v28 = vpop.f32.mrf.mxu1 }
  0xaf   :  { %v306_v29 = vadd.f32 %v445_v10, %v214_v27  ;;  %v310_v30 = vadd.f32 %v445_v10, %v224_v28 }
  0xb0   :  { %329 = vst [vmem:[%s622_s5 + $0x48] sm:$0xff] %v313_v25 }
  0xb1   :  { %333 = vst [vmem:[%s622_s5 + $0x68] sm:$0xff] %v317_v26 }
  0xb2   :  { %322 = vst [vmem:[%s622_s5 + $0x10] sm:$0xff] %v306_v29 }
  0xb3   :  { %326 = vst [vmem:[%s622_s5 + $0x30] sm:$0xff] %v310_v30 }
  0xb5   :  { %v234_v31 = vpop.f32.mrf.mxu2  ;;  %v244_v32 = vpop.f32.mrf.mxu3 }
  0xb6   :  { %v314_v33 = vadd.f32 %v445_v10, %v234_v31  ;;  %v318_v34 = vadd.f32 %v445_v10, %v244_v32  ;;  %v216_v35 = vpop.f32.mrf.mxu0  ;;  %v226_v36 = vpop.f32.mrf.mxu1 }
  0xb7   :  { %v307_v37 = vadd.f32 %v445_v10, %v216_v35  ;;  %v311_v38 = vadd.f32 %v445_v10, %v226_v36 }
  0xb8   :  { %330 = vst [vmem:[%s622_s5 + $0x50] sm:$0xff] %v314_v33 }
  0xb9   :  { %334 = vst [vmem:[%s622_s5 + $0x70] sm:$0xff] %v318_v34 }
  0xba   :  { %323 = vst [vmem:[%s622_s5 + $0x18] sm:$0xff] %v307_v37 }
  0xbb   :  { %327 = vst [vmem:[%s622_s5 + $0x38] sm:$0xff] %v311_v38 }
  0xbd   :  { %v236_v39 = vpop.f32.mrf.mxu2  ;;  %v246_v40 = vpop.f32.mrf.mxu3 }
  0xbe   :  { %v315_v41 = vadd.f32 %v445_v10, %v236_v39  ;;  %v319_v42 = vadd.f32 %v445_v10, %v246_v40 }
  0xc0   :  { %331 = vst [vmem:[%s622_s5 + $0x58] sm:$0xff] %v315_v41 }
  0xc1   :  { %335 = vst [vmem:[%s622_s5 + $0x78] sm:$0xff] %v319_v42 }

// kernel: tile.42
= control target key start
LH: loop header
LB: loop body
LE: loop exit
PB: predicated region body
PF: predicated region fallthrough
CT: control target
= control target key end

     0   :  { %s28_s0 = inlined_call_operand.vmem [shape: f32[16], index: 0, kind: input, shape index: {}]   ;;  %s29_s1 = inlined_call_operand.vmem [shape: f32[16,16], index: 1, kind: output, shape index: {}]  }
   0x1   :  { %v4_v0 = vld [vmem:[%s28_s0] ss:$0 sm:$0xff] }
   0x2   :  { %5 = vst [vmem:[%s29_s1] sm:$0xff] %v4_v0 }
   0x3   :  { %8 = vst [vmem:[%s29_s1 + $0x8] sm:$0xff] %v4_v0 }

// kernel: unet_forward.19
= control target key start
LH: loop header
LB: loop body
LE: loop exit
PB: predicated region body
PF: predicated region fallthrough
CT: control target
= control target key end

     0   :  { %s321_s3 = inlined_call_operand.vmem [shape: bf16[128,128], index: 3, kind: input, shape index: {}]   ;;  %s322_s0 = inlined_call_operand.vmem [shape: bf16[32,128], index: 0, kind: input, shape index: {}]   ;;  %s323_s1 = inlined_call_operand.vmem [shape: f32[1,128], index: 1, kind: input, shape index: {}]   ;;  %s324_s2 = inlined_call_operand.vmem [shape: f32[1,128], index: 2, kind: input, shape index: {}, may-alias: {2,4}]   ;;  %s325_s4 = inlined_call_operand.vmem [shape: f32[1,128], index: 4, kind: input, shape index: {}, may-alias: {2,4}]   ;;  %s326_s5 = inlined_call_operand.vmem [shape: f32[32,128], index: 5, kind: output, shape index: {}]  }
   0x1   :  { %v219_v0 = vld [vmem:[%s321_s3 + $0x38] sm:$0xff]  ;;  %v218_v1 = vld [vmem:[%s321_s3 + $0x30] sm:$0xff]  ;;  %v221_v2 = vld [vmem:[%s322_s0] sm:$0xff]  }
   0x2   :  { %130 = vmatpush.bf16.msra.mxu0 %v219_v0  ;;  %229 = vmatpush.bf16.msra.mxu1 %v219_v0  ;;  %v217_v3 = vld [vmem:[%s321_s3 + $0x28] sm:$0xff]  ;;  %v222_v5 = vunpack.c.l.bf16 %v221_v2  ;;  %v237_v6 = vld [vmem:[%s323_s1] ss:$0 sm:$0xff]  ;;  %v223_v7 = vunpack.c.h.bf16 %v221_v2  ;;  %v215_v16 = vld [vmem:[%s321_s3 + $0x18] sm:$0xff] }
   0x3   :  { %v228_v4 = vld [vmem:[%s322_s0 + $0x8] sm:$0xff]   ;;  %v216_v10 = vld [vmem:[%s321_s3 + $0x20] sm:$0xff]  ;;  %v214_v21 = vld [vmem:[%s321_s3 + $0x10] sm:$0xff] }
   0x4   :  { %v226_v8 = vunpack.c.l.bf16 %v228_v4  ;;  %v227_v9 = vunpack.c.h.bf16 %v228_v4  ;;  %v40_v11 = vmul.f32 %v237_v6, %v222_v5  ;;  %v238_v12 = vld [vmem:[%s324_s2] ss:$0 sm:$0xff]  ;;  %v41_v13 = vmul.f32 %v237_v6, %v223_v7  ;;  %v213_v26 = vld [vmem:[%s321_s3 + $0x8] sm:$0xff] }
   0x5   :  { %v212_v31 = vld [vmem:[%s321_s3] sm:$0xff] }
   0x6   :  { %131 = vmatpush.bf16.msra.mxu0 %v218_v1  ;;  %230 = vmatpush.bf16.msra.mxu1 %v218_v1  ;;  %v42_v14 = vmul.f32 %v237_v6, %v226_v8  ;;  %v43_v15 = vmul.f32 %v237_v6, %v227_v9  ;;  %v48_v17 = vadd.f32 %v238_v12, %v40_v11  ;;  %v239_v34 = vld [vmem:[%s325_s4] ss:$0 sm:$0xff] }
   0x7   :  { %v49_v18 = vadd.f32 %v238_v12, %v41_v13 }
   0x8   :  { %v50_v19 = vadd.f32 %v238_v12, %v42_v14  ;;  %v51_v20 = vadd.f32 %v238_v12, %v43_v15  ;;  %v52_v22 = vmul.f32 0.2, %v48_v17 }
   0x9   :  { %v53_v23 = vmul.f32 0.2, %v49_v18 }
   0xa   :  { %132 = vmatpush.bf16.msra.mxu0 %v217_v3  ;;  %231 = vmatpush.bf16.msra.mxu1 %v217_v3  ;;  %v54_v24 = vmul.f32 0.2, %v50_v19  ;;  %v55_v25 = vmul.f32 0.2, %v51_v20  ;;  %v56_v27 = vmax.f32 %v48_v17, %v52_v22 }
   0xb   :  { %v57_v28 = vmax.f32 %v49_v18, %v53_v23 }
   0xc   :  { %v58_v29 = vmax.f32 %v50_v19, %v54_v24  ;;  %v59_v30 = vmax.f32 %v51_v20, %v55_v25 }
   0xd   :  { %v64_v32 = vpack.c.bf16 %v57_v28, %v56_v27 }
   0xe   :  { %133 = vmatpush.bf16.msra.mxu0 %v216_v10  ;;  %232 = vmatpush.bf16.msra.mxu1 %v216_v10  ;;  %v65_v33 = vpack.c.bf16 %v59_v30, %v58_v29 }
  0x12   :  { %134 = vmatpush.bf16.msra.mxu0 %v215_v16  ;;  %233 = vmatpush.bf16.msra.mxu1 %v215_v16 }
  0x16   :  { %135 = vmatpush.bf16.msra.mxu0 %v214_v21  ;;  %234 = vmatpush.bf16.msra.mxu1 %v214_v21 }
  0x1a   :  { %136 = vmatpush.bf16.msra.mxu0 %v213_v26  ;;  %235 = vmatpush.bf16.msra.mxu1 %v213_v26 }
  0x1e   :  { %137 = vmatpush.bf16.msra.mxu0 %v212_v31  ;;  %236 = vmatpush.bf16.msra.mxu1 %v212_v31 }
  0x21   :  { %138 = vmatmul.bf16.vlgmr.msra.gmra.mxu0 %v64_v32  ;;  %143 = vmatmul.bf16.vlgmr.msra.gmra.mxu1 %v65_v33 }
  0x9e   :  { %v139_v35 = vpop.f32.mrf.mxu0  ;;  %v144_v36 = vpop.f32.mrf.mxu1 }
  0x9f   :  { %v168_v37 = vadd.f32 %v239_v34, %v139_v35  ;;  %v170_v38 = vadd.f32 %v239_v34, %v144_v36 }
  0xa1   :  { %172 = vst [vmem:[%s326_s5] sm:$0xff] %v168_v37 }
  0xa2   :  { %174 = vst [vmem:[%s326_s5 + $0x10] sm:$0xff] %v170_v38 }
  0xa6   :  { %v141_v39 = vpop.f32.mrf.mxu0  ;;  %v146_v40 = vpop.f32.mrf.mxu1 }
  0xa7   :  { %v169_v41 = vadd.f32 %v239_v34, %v141_v39  ;;  %v171_v42 = vadd.f32 %v239_v34, %v146_v40 }
  0xa9   :  { %173 = vst [vmem:[%s326_s5 + $0x8] sm:$0xff] %v169_v41 }
  0xaa   :  { %175 = vst [vmem:[%s326_s5 + $0x18] sm:$0xff] %v171_v42 }

// kernel: unet_forward.20
= control target key start
LH: loop header
LB: loop body
LE: loop exit
PB: predicated region body
PF: predicated region fallthrough
CT: control target
= control target key end

     0   :  { %v45_v0 = vmov 0.0   ;;  %s82_s1 = inlined_call_operand.vmem [shape: f32[1,128], index: 1, kind: output, shape index: {0}]   ;;  %s83_s2 = inlined_call_operand.vmem [shape: f32[1,128], index: 2, kind: output, shape index: {1}]   ;;  %s84_s0 = inlined_call_operand.vmem [shape: f32[8,128], index: 0, kind: input, shape index: {}]  }
   0x1   :  { %14 = vst [vmem:[%s82_s1] sm:$0x1] %v45_v0  ;;  %v16_v1 = vld [vmem:[%s84_s0] sm:$0xff] }
   0x2   :  { %15 = vst [vmem:[%s83_s2] sm:$0x1] %v45_v0  ;;  %v18_v2 = vrot.slane %v16_v1, 4  ;;  %v27_v3 = vmul.f32 %v16_v1, %v16_v1 }
   0x4   :  { %v19_v4 = vadd.f32 %v18_v2, %v16_v1  ;;  %v28_v5 = vrot.slane %v27_v3, 4 }
   0x6   :  { %v20_v6 = vrot.slane %v19_v4, 2  ;;  %v29_v7 = vadd.f32 %v28_v5, %v27_v3 }
   0x8   :  { %v21_v8 = vadd.f32 %v20_v6, %v19_v4  ;;  %v30_v9 = vrot.slane %v29_v7, 2  ;;  %v17_v12 = vld [vmem:[%s82_s1] sm:$0x1] }
   0x9   :  { %v26_v15 = vld [vmem:[%s83_s2] sm:$0x1] }
   0xa   :  { %v22_v10 = vrot.slane %v21_v8, 1  ;;  %v31_v11 = vadd.f32 %v30_v9, %v29_v7 }
   0xc   :  { %v23_v13 = vadd.f32 %v22_v10, %v21_v8  ;;  %v32_v14 = vrot.slane %v31_v11, 1 }
   0xe   :  { %v24_v16 = vadd.f32 %v23_v13, %v17_v12  ;;  %v33_v17 = vadd.f32 %v32_v14, %v31_v11 }
  0x10   :  { %25 = vst [vmem:[%s82_s1] sm:$0x1] %v24_v16  ;;  %v34_v18 = vadd.f32 %v33_v17, %v26_v15 }
  0x12   :  { %35 = vst [vmem:[%s83_s2] sm:$0x1] %v34_v18 }

// kernel: tile.47
= control target key start
LH: loop header
LB: loop body
LE: loop exit
PB: predicated region body
PF: predicated region fallthrough
CT: control target
= control target key end

     0   :  { %s22_s0 = inlined_call_operand.vmem [shape: f32[32], index: 0, kind: input, shape index: {}]   ;;  %s23_s1 = inlined_call_operand.vmem [shape: f32[4,32], index: 1, kind: output, shape index: {}]  }
   0x1   :  { %v4_v0 = vld [vmem:[%s22_s0] ss:$0 sm:$0xff] }
   0x2   :  { %5 = vst [vmem:[%s23_s1] sm:$0xf] %v4_v0 }

// kernel: unet_forward.21
= control target key start
LH: loop header
LB: loop body
LE: loop exit
PB: predicated region body
PF: predicated region fallthrough
CT: control target
= control target key end

     0   :  { %s395_s3 = inlined_call_operand.vmem [shape: bf16[256,128], index: 3, kind: input, shape index: {}]   ;;  %s396_s0 = inlined_call_operand.vmem [shape: bf16[8,256], index: 0, kind: input, shape index: {}]   ;;  %s397_s1 = inlined_call_operand.vmem [shape: f32[1,256], index: 1, kind: input, shape index: {}]   ;;  %s398_s2 = inlined_call_operand.vmem [shape: f32[1,256], index: 2, kind: input, shape index: {}]   ;;  %s399_s4 = inlined_call_operand.vmem [shape: f32[1,128], index: 4, kind: input, shape index: {}]   ;;  %s400_s5 = inlined_call_operand.vmem [shape: f32[8,128], index: 5, kind: output, shape index: {}]  }
   0x1   :  { %v292_v0 = vld [vmem:[%s395_s3 + $0x38] sm:$0xff]  ;;  %v291_v2 = vld [vmem:[%s395_s3 + $0x30] sm:$0xff]  ;;  %v290_v4 = vld [vmem:[%s395_s3 + $0x28] sm:$0xff] }
   0x2   :  { %v300_v1 = vld [vmem:[%s395_s3 + $0x78] sm:$0xff]  ;;  %179 = vmatpush.bf16.msra.mxu0 %v292_v0  ;;  %v299_v3 = vld [vmem:[%s395_s3 + $0x70] sm:$0xff]  ;;  %v298_v5 = vld [vmem:[%s395_s3 + $0x68] sm:$0xff] }
   0x3   :  { %192 = vmatpush.bf16.msra.mxu1 %v300_v1  ;;  %v25_v6 = vld [vmem:[%s396_s0] sm:$0xff]  ;;  %v288_v19 = vld [vmem:[%s395_s3 + $0x18] sm:$0xff]  ;;  %v287_v23 = vld [vmem:[%s395_s3 + $0x10] sm:$0xff] }
   0x4   :  { %v28_v7 = vld [vmem:[%s397_s1] sm:$0x3]  ;;  %v26_v8 = vunpack.c.l.bf16 %v25_v6  ;;  %v27_v10 = vunpack.c.h.bf16 %v25_v6  ;;  %v296_v20 = vld [vmem:[%s395_s3 + $0x58] sm:$0xff]  ;;  %v295_v24 = vld [vmem:[%s395_s3 + $0x50] sm:$0xff] }
   0x5   :  { %v30_v9 = vperm.slane %v28_v7, 0  ;;  %v31_v11 = vperm.slane %v28_v7, 1  ;;  %v289_v12 = vld [vmem:[%s395_s3 + $0x20] sm:$0xff]  ;;  %v286_v27 = vld [vmem:[%s395_s3 + $0x8] sm:$0xff] }
   0x6   :  { %180 = vmatpush.bf16.msra.mxu0 %v291_v2  ;;  %v297_v13 = vld [vmem:[%s395_s3 + $0x60] sm:$0xff]  ;;  %v294_v28 = vld [vmem:[%s395_s3 + $0x48] sm:$0xff] }
   0x7   :  { %193 = vmatpush.bf16.msra.mxu1 %v299_v3  ;;  %v36_v14 = vld [vmem:[%s398_s2] sm:$0x3]  ;;  %v34_v15 = vmul.f32 %v30_v9, %v26_v8  ;;  %v35_v17 = vmul.f32 %v31_v11, %v27_v10 }
   0x8   :  { %v38_v16 = vperm.slane %v36_v14, 0  ;;  %v39_v18 = vperm.slane %v36_v14, 1  ;;  %v285_v31 = vld [vmem:[%s395_s3] sm:$0xff] }
   0x9   :  { %v293_v32 = vld [vmem:[%s395_s3 + $0x40] sm:$0xff] }
   0xa   :  { %181 = vmatpush.bf16.msra.mxu0 %v290_v4  ;;  %v42_v21 = vadd.f32 %v38_v16, %v34_v15  ;;  %v43_v22 = vadd.f32 %v39_v18, %v35_v17  ;;  %v301_v35 = vld [vmem:[%s399_s4] ss:$0 sm:$0xff] }
   0xb   :  { %194 = vmatpush.bf16.msra.mxu1 %v298_v5 }
   0xc   :  { %v44_v25 = vmul.f32 0.2, %v42_v21  ;;  %v45_v26 = vmul.f32 0.2, %v43_v22 }
   0xe   :  { %182 = vmatpush.bf16.msra.mxu0 %v289_v12  ;;  %v46_v29 = vmax.f32 %v42_v21, %v44_v25  ;;  %v47_v30 = vmax.f32 %v43_v22, %v45_v26 }
   0xf   :  { %195 = vmatpush.bf16.msra.mxu1 %v297_v13 }
  0x10   :  { %v49_v33 = vpack.c.bf16 %v46_v29, %v46_v29  ;;  %v50_v34 = vpack.c.bf16 %v47_v30, %v47_v30 }
  0x12   :  { %183 = vmatpush.bf16.msra.mxu0 %v288_v19 }
  0x13   :  { %196 = vmatpush.bf16.msra.mxu1 %v296_v20 }
  0x16   :  { %184 = vmatpush.bf16.msra.mxu0 %v287_v23 }
  0x17   :  { %197 = vmatpush.bf16.msra.mxu1 %v295_v24 }
  0x1a   :  { %185 = vmatpush.bf16.msra.mxu0 %v286_v27 }
  0x1b   :  { %198 = vmatpush.bf16.msra.mxu1 %v294_v28 }
  0x1e   :  { %186 = vmatpush.bf16.msra.mxu0 %v285_v31 }
  0x1f   :  { %199 = vmatpush.bf16.msra.mxu1 %v293_v32 }
  0x21   :  { %187 = vmatmul.bf16.vlgmr.msra.gmra.mxu0 %v49_v33 }
  0x22   :  { %200 = vmatmul.bf16.vlgmr.msra.gmra.mxu1 %v50_v34 }
  0x9e   :  { %v188_v36 = vpop.f32.mrf.mxu0 }
  0x9f   :  { %v201_v37 = vpop.f32.mrf.mxu1 }
  0xa0   :  { %v202_v38 = vadd.f32 %v201_v37, %v188_v36 }
  0xa2   :  { %v215_v39 = vadd.f32 %v301_v35, %v202_v38 }
  0xa4   :  { %216 = vst [vmem:[%s400_s5] sm:$0xff] %v215_v39 }
  0xa6   :  { %v190_v40 = vpop.f32.mrf.mxu0 }
  0xa7   :  { %v203_v41 = vpop.f32.mrf.mxu1 }

// kernel: unet_forward.22
= control target key start
LH: loop header
LB: loop body
LE: loop exit
PB: predicated region body
PF: predicated region fallthrough
CT: control target
= control target key end

     0   :  { %s245_s3 = inlined_call_operand.vmem [shape: bf16[128,128], index: 3, kind: input, shape index: {}]   ;;  %s246_s1 = inlined_call_operand.vmem [shape: f32[1,128], index: 1, kind: input, shape index: {}]   ;;  %s247_s2 = inlined_call_operand.vmem [shape: f32[1,128], index: 2, kind: input, shape index: {}, may-alias: {2,4}]   ;;  %s248_s4 = inlined_call_operand.vmem [shape: f32[1,128], index: 4, kind: input, shape index: {}, may-alias: {2,4}]   ;;  %s249_s0 = inlined_call_operand.vmem [shape: bf16[8,128], index: 0, kind: input, shape index: {}]   ;;  %s250_s5 = inlined_call_operand.vmem [shape: f32[8,128], index: 5, kind: output, shape index: {}]  }
   0x1   :  { %v172_v0 = vld [vmem:[%s245_s3 + $0x38] sm:$0xff]  ;;  %v171_v1 = vld [vmem:[%s245_s3 + $0x30] sm:$0xff]  ;;  %v170_v2 = vld [vmem:[%s245_s3 + $0x28] sm:$0xff] }
   0x2   :  { %104 = vmatpush.bf16.msra.mxu0 %v172_v0  ;;  %v169_v3 = vld [vmem:[%s245_s3 + $0x20] sm:$0xff]  ;;  %v168_v7 = vld [vmem:[%s245_s3 + $0x18] sm:$0xff]  ;;  %v167_v10 = vld [vmem:[%s245_s3 + $0x10] sm:$0xff] }
   0x3   :  { %v25_v4 = vld [vmem:[%s249_s0] sm:$0xf]  ;;  %v166_v12 = vld [vmem:[%s245_s3 + $0x8] sm:$0xff] }
   0x4   :  { %v26_v5 = vunpack.c.l.bf16 %v25_v4  ;;  %v173_v6 = vld [vmem:[%s246_s1] ss:$0 sm:$0xff] }
   0x5   :  { %v174_v9 = vld [vmem:[%s247_s2] ss:$0 sm:$0xff] }
   0x6   :  { %105 = vmatpush.bf16.msra.mxu0 %v171_v1  ;;  %v31_v8 = vmul.f32 %v173_v6, %v26_v5  ;;  %v165_v14 = vld [vmem:[%s245_s3] sm:$0xff] }
   0x7   :  { %v175_v16 = vld [vmem:[%s248_s4] ss:$0 sm:$0xff] }
   0x8   :  { %v36_v11 = vadd.f32 %v174_v9, %v31_v8 }
   0xa   :  { %106 = vmatpush.bf16.msra.mxu0 %v170_v2  ;;  %v37_v13 = vmax.f32 %v36_v11, 0.0 }
   0xc   :  { %v39_v15 = vpack.c.bf16 %v37_v13, %v37_v13 }
   0xe   :  { %107 = vmatpush.bf16.msra.mxu0 %v169_v3 }
  0x12   :  { %108 = vmatpush.bf16.msra.mxu0 %v168_v7 }
  0x16   :  { %109 = vmatpush.bf16.msra.mxu0 %v167_v10 }
  0x1a   :  { %110 = vmatpush.bf16.msra.mxu0 %v166_v12 }
  0x1e   :  { %111 = vmatpush.bf16.msra.mxu0 %v165_v14 }
  0x21   :  { %112 = vmatmul.bf16.vlgmr.msra.gmra.mxu0 %v39_v15 }
  0x9e   :  { %v113_v17 = vpop.f32.mrf.mxu0 }
  0x9f   :  { %v127_v18 = vadd.f32 %v175_v16, %v113_v17 }
  0xa1   :  { %128 = vst [vmem:[%s250_s5] sm:$0xff] %v127_v18 }
  0xa6   :  { %v115_v19 = vpop.f32.mrf.mxu0 }

// kernel: unet_forward.29
= control target key start
LH: loop header
LB: loop body
LE: loop exit
PB: predicated region body
PF: predicated region fallthrough
CT: control target
= control target key end

     0   :  { %s317_s3 = inlined_call_operand.vmem [shape: bf16[128,128], index: 3, kind: input, shape index: {}]   ;;  %s318_s1 = inlined_call_operand.vmem [shape: f32[1,128], index: 1, kind: input, shape index: {}]   ;;  %s319_s2 = inlined_call_operand.vmem [shape: f32[1,128], index: 2, kind: input, shape index: {}]   ;;  %s320_s4 = inlined_call_operand.vmem [shape: f32[1,128], index: 4, kind: input, shape index: {}]   ;;  %s321_s0 = inlined_call_operand.vmem [shape: bf16[32,128], index: 0, kind: input, shape index: {}]   ;;  %s322_s5 = inlined_call_operand.vmem [shape: f32[32,128], index: 5, kind: output, shape index: {}]  }
   0x1   :  { %v215_v0 = vld [vmem:[%s317_s3 + $0x38] sm:$0xff]  ;;  %v214_v1 = vld [vmem:[%s317_s3 + $0x30] sm:$0xff]  ;;  %v213_v2 = vld [vmem:[%s317_s3 + $0x28] sm:$0xff] }
   0x2   :  { %126 = vmatpush.bf16.msra.mxu0 %v215_v0  ;;  %225 = vmatpush.bf16.msra.mxu1 %v215_v0  ;;  %v212_v3 = vld [vmem:[%s317_s3 + $0x20] sm:$0xff]  ;;  %v224_v5 = vld [vmem:[%s321_s0 + $0x8] sm:$0xff]   ;;  %v211_v11 = vld [vmem:[%s317_s3 + $0x18] sm:$0xff] }
   0x3   :  { %v217_v4 = vld [vmem:[%s321_s0] sm:$0xff]   ;;  %v222_v9 = vunpack.c.l.bf16 %v224_v5  ;;  %v223_v10 = vunpack.c.h.bf16 %v224_v5  ;;  %v210_v17 = vld [vmem:[%s317_s3 + $0x10] sm:$0xff]  ;;  %v209_v22 = vld [vmem:[%s317_s3 + $0x8] sm:$0xff] }
   0x4   :  { %v218_v6 = vunpack.c.l.bf16 %v217_v4  ;;  %v219_v7 = vunpack.c.h.bf16 %v217_v4  ;;  %v233_v8 = vld [vmem:[%s318_s1] ss:$0 sm:$0xff] }
   0x5   :  { %v234_v14 = vld [vmem:[%s319_s2] ss:$0 sm:$0xff]  ;;  %v42_v15 = vmul.f32 %v233_v8, %v222_v9  ;;  %v43_v16 = vmul.f32 %v233_v8, %v223_v10 }
   0x6   :  { %127 = vmatpush.bf16.msra.mxu0 %v214_v1  ;;  %226 = vmatpush.bf16.msra.mxu1 %v214_v1  ;;  %v40_v12 = vmul.f32 %v233_v8, %v218_v6  ;;  %v41_v13 = vmul.f32 %v233_v8, %v219_v7  ;;  %v208_v27 = vld [vmem:[%s317_s3] sm:$0xff] }
   0x7   :  { %v50_v20 = vadd.f32 %v234_v14, %v42_v15  ;;  %v51_v21 = vadd.f32 %v234_v14, %v43_v16  ;;  %v235_v30 = vld [vmem:[%s320_s4] ss:$0 sm:$0xff] }
   0x8   :  { %v48_v18 = vadd.f32 %v234_v14, %v40_v12  ;;  %v49_v19 = vadd.f32 %v234_v14, %v41_v13 }
   0x9   :  { %v54_v25 = vmax.f32 %v50_v20, 0.0  ;;  %v55_v26 = vmax.f32 %v51_v21, 0.0 }
   0xa   :  { %128 = vmatpush.bf16.msra.mxu0 %v213_v2  ;;  %227 = vmatpush.bf16.msra.mxu1 %v213_v2  ;;  %v52_v23 = vmax.f32 %v48_v18, 0.0  ;;  %v53_v24 = vmax.f32 %v49_v19, 0.0 }
   0xb   :  { %v61_v29 = vpack.c.bf16 %v55_v26, %v54_v25 }
   0xc   :  { %v60_v28 = vpack.c.bf16 %v53_v24, %v52_v23 }
   0xe   :  { %129 = vmatpush.bf16.msra.mxu0 %v212_v3  ;;  %228 = vmatpush.bf16.msra.mxu1 %v212_v3 }
  0x12   :  { %130 = vmatpush.bf16.msra.mxu0 %v211_v11  ;;  %229 = vmatpush.bf16.msra.mxu1 %v211_v11 }
  0x16   :  { %131 = vmatpush.bf16.msra.mxu0 %v210_v17  ;;  %230 = vmatpush.bf16.msra.mxu1 %v210_v17 }
  0x1a   :  { %132 = vmatpush.bf16.msra.mxu0 %v209_v22  ;;  %231 = vmatpush.bf16.msra.mxu1 %v209_v22 }
  0x1e   :  { %133 = vmatpush.bf16.msra.mxu0 %v208_v27  ;;  %232 = vmatpush.bf16.msra.mxu1 %v208_v27 }
  0x21   :  { %134 = vmatmul.bf16.vlgmr.msra.gmra.mxu0 %v60_v28  ;;  %139 = vmatmul.bf16.vlgmr.msra.gmra.mxu1 %v61_v29 }
  0x9e   :  { %v135_v31 = vpop.f32.mrf.mxu0  ;;  %v140_v32 = vpop.f32.mrf.mxu1 }
  0x9f   :  { %v164_v33 = vadd.f32 %v235_v30, %v135_v31  ;;  %v166_v34 = vadd.f32 %v235_v30, %v140_v32 }
  0xa1   :  { %168 = vst [vmem:[%s322_s5] sm:$0xff] %v164_v33 }
  0xa2   :  { %170 = vst [vmem:[%s322_s5 + $0x10] sm:$0xff] %v166_v34 }
  0xa6   :  { %v137_v35 = vpop.f32.mrf.mxu0  ;;  %v142_v36 = vpop.f32.mrf.mxu1 }
  0xa7   :  { %v165_v37 = vadd.f32 %v235_v30, %v137_v35  ;;  %v167_v38 = vadd.f32 %v235_v30, %v142_v36 }
  0xa9   :  { %169 = vst [vmem:[%s322_s5 + $0x8] sm:$0xff] %v165_v37 }
  0xaa   :  { %171 = vst [vmem:[%s322_s5 + $0x18] sm:$0xff] %v167_v38 }

// kernel: tile.57
= control target key start
LH: loop header
LB: loop body
LE: loop exit
PB: predicated region body
PF: predicated region fallthrough
CT: control target
= control target key end

     0   :  { %s22_s0 = inlined_call_operand.vmem [shape: f32[16], index: 0, kind: input, shape index: {}]   ;;  %s23_s1 = inlined_call_operand.vmem [shape: f32[4,16], index: 1, kind: output, shape index: {}]  }
   0x1   :  { %v4_v0 = vld [vmem:[%s22_s0] ss:$0 sm:$0xff] }
   0x2   :  { %5 = vst [vmem:[%s23_s1] sm:$0xf] %v4_v0 }

// kernel: tile.58
= control target key start
LH: loop header
LB: loop body
LE: loop exit
PB: predicated region body
PF: predicated region fallthrough
CT: control target
= control target key end

     0   :  { %s37_s8 = smov 16   ;;  %s38_s9 = smov 32   ;;  %vm7_vm0 = vcmask 130048   ;;  %vm13_vm1 = vcmask 523648   ;;  %vm19_vm2 = vcmask 392448   ;;  %vm25_vm3 = vcmask 261248   ;;  %s55_s0 = inlined_call_operand.vmem [shape: f32[4,16], index: 0, kind: input, shape index: {}]   ;;  %s56_s1 = inlined_call_operand.vmem [shape: f32[64], index: 1, kind: output, shape index: {}]  }
   0x1   :  { %v4_v0 = vld [vmem:[%s55_s0] sm:$0xf]  ;;  %s36_s0 = smov 48  }
   0x2   :  { %5 = vst [vmem:[#allocation1] sm:$0xf] %v4_v0 }
   0x9   :  { %v10_v1 = vld [vmem:[#allocation1 + $0x3] sm:$0x1]   ;;  %v22_v2 = vld [vmem:[#allocation1 + $0x1] sm:$0x1]   ;;  %v16_v3 = vld [vmem:[#allocation1 + $0x2] sm:$0x1]  }
   0xa   :  { %11 = vrot.lane.b32.xlu0 %v10_v1, %s36_s0  ;;  %23 = vrot.lane.b32.xlu1 %v22_v2, %s37_s8  ;;  %v6_v4 = vld [vmem:[#allocation1] sm:$0x1]  }
   0xb   :  { %8 = vst.msk [vmem:[#allocation0] sm:$0x1] %vm7_vm0, %v6_v4  }
  0x12   :  { %17 = vrot.lane.b32.xlu0 %v16_v3, %s38_s9 }
  0x7c   :  { %v12_v5 = vpop.permute.xlu0 %11   ;;  %v24_v6 = vpop.permute.xlu1 %23  }
  0x7d   :  { %14 = vst.msk [vmem:[#allocation0] sm:$0x1] %vm13_vm1, %v12_v5  }
  0x84   :  { %v18_v7 = vpop.permute.xlu0 %17  }
  0x85   :  { %20 = vst.msk [vmem:[#allocation0] sm:$0x1] %vm19_vm2, %v18_v7  }
  0x86   :  { %26 = vst.msk [vmem:[#allocation0] sm:$0x1] %vm25_vm3, %v24_v6  }
  0x8d   :  { %v29_v8 = vld [vmem:[#allocation0] sm:$0x1] }
  0x8e   :  { %32 = vst [vmem:[%s56_s1] sm:$0x1] %v29_v8 }

// kernel: unet_forward.34
= control target key start
LH: loop header
LB: loop body
LE: loop exit
PB: predicated region body
PF: predicated region fallthrough
CT: control target
= control target key end

     0   :  { %s1182_s3 = inlined_call_operand.vmem [shape: bf16[128,128], index: 3, kind: input, shape index: {}]   ;;  %s1183_s1 = inlined_call_operand.vmem [shape: f32[1,128], index: 1, kind: input, shape index: {}]   ;;  %s1184_s2 = inlined_call_operand.vmem [shape: f32[1,128], index: 2, kind: input, shape index: {}]   ;;  %s1185_s4 = inlined_call_operand.vmem [shape: f32[1,128], index: 4, kind: input, shape index: {}]   ;;  %s1186_s0 = inlined_call_operand.vmem [shape: bf16[128,128], index: 0, kind: input, shape index: {}]   ;;  %s1187_s5 = inlined_call_operand.vmem [shape: f32[128,128], index: 5, kind: output, shape index: {}]  }
   0x1   :  { %v699_v0 = vld [vmem:[%s1182_s3 + $0x38] sm:$0xff]  ;;  %v698_v1 = vld [vmem:[%s1182_s3 + $0x30] sm:$0xff]  ;;  %v697_v2 = vld [vmem:[%s1182_s3 + $0x28] sm:$0xff] }
   0x2   :  { %216 = vmatpush.bf16.msra.mxu0 %v699_v0  ;;  %739 = vmatpush.bf16.msra.mxu1 %v699_v0  ;;  %v701_v3 = vld [vmem:[%s1186_s0] sm:$0xff]   ;;  %v733_v5 = vld [vmem:[%s1186_s0 + $0x10] sm:$0xff]   ;;  %v695_v15 = vld [vmem:[%s1182_s3 + $0x18] sm:$0xff] }
   0x3   :  { %740 = vmatpush.bf16.msra.mxu2 %v699_v0  ;;  %741 = vmatpush.bf16.msra.mxu3 %v699_v0  ;;  %v696_v4 = vld [vmem:[%s1182_s3 + $0x20] sm:$0xff]  ;;  %v737_v7 = vld [vmem:[%s1186_s0 + $0x30] sm:$0xff]   ;;  %v702_v8 = vunpack.c.l.bf16 %v701_v3  ;;  %v703_v9 = vunpack.c.h.bf16 %v701_v3  ;;  %v710_v11 = vunpack.c.l.bf16 %v733_v5  ;;  %v711_v12 = vunpack.c.h.bf16 %v733_v5  ;;  %v693_v34 = vld [vmem:[%s1182_s3 + $0x8] sm:$0xff] }
   0x4   :  { %v735_v6 = vld [vmem:[%s1186_s0 + $0x20] sm:$0xff]   ;;  %v726_v16 = vunpack.c.l.bf16 %v737_v7  ;;  %v727_v17 = vunpack.c.h.bf16 %v737_v7  ;;  %v694_v25 = vld [vmem:[%s1182_s3 + $0x10] sm:$0xff]  ;;  %v732_v43 = vld [vmem:[%s1186_s0 + $0x8] sm:$0xff]  }
   0x5   :  { %v887_v10 = vld [vmem:[%s1183_s1] ss:$0 sm:$0xff]  ;;  %v718_v13 = vunpack.c.l.bf16 %v735_v6  ;;  %v719_v14 = vunpack.c.h.bf16 %v735_v6  ;;  %v734_v44 = vld [vmem:[%s1186_s0 + $0x18] sm:$0xff]   ;;  %v736_v48 = vld [vmem:[%s1186_s0 + $0x28] sm:$0xff]   ;;  %v706_v51 = vunpack.c.l.bf16 %v732_v43  ;;  %v707_v52 = vunpack.c.h.bf16 %v732_v43 }
   0x6   :  { %217 = vmatpush.bf16.msra.mxu0 %v698_v1  ;;  %742 = vmatpush.bf16.msra.mxu1 %v698_v1  ;;  %v76_v18 = vmul.f32 %v887_v10, %v702_v8  ;;  %v77_v19 = vmul.f32 %v887_v10, %v703_v9  ;;  %v897_v20 = vld [vmem:[%s1184_s2] ss:$0 sm:$0xff]  ;;  %v80_v21 = vmul.f32 %v887_v10, %v710_v11  ;;  %v738_v49 = vld [vmem:[%s1186_s0 + $0x38] sm:$0xff]   ;;  %v714_v53 = vunpack.c.l.bf16 %v734_v44 }
   0x7   :  { %743 = vmatpush.bf16.msra.mxu2 %v698_v1  ;;  %744 = vmatpush.bf16.msra.mxu3 %v698_v1  ;;  %v81_v22 = vmul.f32 %v887_v10, %v711_v12  ;;  %v84_v23 = vmul.f32 %v887_v10, %v718_v13  ;;  %v85_v24 = vmul.f32 %v887_v10, %v719_v14  ;;  %v692_v45 = vld [vmem:[%s1182_s3] sm:$0xff]  ;;  %v715_v56 = vunpack.c.h.bf16 %v734_v44 }
   0x8   :  { %v88_v26 = vmul.f32 %v887_v10, %v726_v16  ;;  %v89_v27 = vmul.f32 %v887_v10, %v727_v17  ;;  %v96_v28 = vadd.f32 %v897_v20, %v76_v18  ;;  %v97_v29 = vadd.f32 %v897_v20, %v77_v19 }
   0x9   :  { %v100_v30 = vadd.f32 %v897_v20, %v80_v21  ;;  %v101_v31 = vadd.f32 %v897_v20, %v81_v22  ;;  %v104_v32 = vadd.f32 %v897_v20, %v84_v23  ;;  %v105_v33 = vadd.f32 %v897_v20, %v85_v24 }
   0xa   :  { %218 = vmatpush.bf16.msra.mxu0 %v697_v2  ;;  %745 = vmatpush.bf16.msra.mxu1 %v697_v2  ;;  %v108_v35 = vadd.f32 %v897_v20, %v88_v26  ;;  %v109_v36 = vadd.f32 %v897_v20, %v89_v27  ;;  %v112_v37 = vmax.f32 %v96_v28, 0.0  ;;  %v113_v38 = vmax.f32 %v97_v29, 0.0 }
   0xb   :  { %746 = vmatpush.bf16.msra.mxu2 %v697_v2  ;;  %747 = vmatpush.bf16.msra.mxu3 %v697_v2  ;;  %v116_v39 = vmax.f32 %v100_v30, 0.0  ;;  %v117_v40 = vmax.f32 %v101_v31, 0.0  ;;  %v120_v41 = vmax.f32 %v104_v32, 0.0  ;;  %v121_v42 = vmax.f32 %v105_v33, 0.0 }
   0xc   :  { %v124_v46 = vmax.f32 %v108_v35, 0.0  ;;  %v125_v47 = vmax.f32 %v109_v36, 0.0  ;;  %v144_v50 = vpack.c.bf16 %v113_v38, %v112_v37  ;;  %v722_v57 = vunpack.c.l.bf16 %v736_v48 }
   0xd   :  { %v146_v54 = vpack.c.bf16 %v117_v40, %v116_v39  ;;  %v148_v55 = vpack.c.bf16 %v121_v42, %v120_v41  ;;  %v723_v59 = vunpack.c.h.bf16 %v736_v48  ;;  %v730_v60 = vunpack.c.l.bf16 %v738_v49 }
   0xe   :  { %219 = vmatpush.bf16.msra.mxu0 %v696_v4  ;;  %748 = vmatpush.bf16.msra.mxu1 %v696_v4  ;;  %v150_v58 = vpack.c.bf16 %v125_v47, %v124_v46  ;;  %v731_v61 = vunpack.c.h.bf16 %v738_v49  ;;  %v78_v62 = vmul.f32 %v887_v10, %v706_v51  ;;  %v79_v63 = vmul.f32 %v887_v10, %v707_v52 }
   0xf   :  { %749 = vmatpush.bf16.msra.mxu2 %v696_v4  ;;  %750 = vmatpush.bf16.msra.mxu3 %v696_v4  ;;  %v82_v0 = vmul.f32 %v887_v10, %v714_v53  ;;  %v83_v1 = vmul.f32 %v887_v10, %v715_v56  ;;  %v86_v2 = vmul.f32 %v887_v10, %v722_v57 }
  0x10   :  { %v87_v3 = vmul.f32 %v887_v10, %v723_v59  ;;  %v90_v4 = vmul.f32 %v887_v10, %v730_v60  ;;  %v91_v5 = vmul.f32 %v887_v10, %v731_v61  ;;  %v98_v6 = vadd.f32 %v897_v20, %v78_v62 }
  0x11   :  { %v99_v7 = vadd.f32 %v897_v20, %v79_v63  ;;  %v102_v8 = vadd.f32 %v897_v20, %v82_v0  ;;  %v103_v9 = vadd.f32 %v897_v20, %v83_v1  ;;  %v106_v11 = vadd.f32 %v897_v20, %v86_v2 }
  0x12   :  { %220 = vmatpush.bf16.msra.mxu0 %v695_v15  ;;  %751 = vmatpush.bf16.msra.mxu1 %v695_v15  ;;  %v107_v12 = vadd.f32 %v897_v20, %v87_v3  ;;  %v110_v13 = vadd.f32 %v897_v20, %v90_v4  ;;  %v111_v14 = vadd.f32 %v897_v20, %v91_v5  ;;  %v953_v20 = vld [vmem:[%s1185_s4] ss:$0 sm:$0xff] }
  0x13   :  { %752 = vmatpush.bf16.msra.mxu2 %v695_v15  ;;  %753 = vmatpush.bf16.msra.mxu3 %v695_v15  ;;  %v114_v15 = vmax.f32 %v98_v6, 0.0  ;;  %v115_v16 = vmax.f32 %v99_v7, 0.0  ;;  %v118_v17 = vmax.f32 %v102_v8, 0.0  ;;  %v119_v10 = vmax.f32 %v103_v9, 0.0 }
  0x14   :  { %v122_v18 = vmax.f32 %v106_v11, 0.0  ;;  %v123_v19 = vmax.f32 %v107_v12, 0.0  ;;  %v126_v21 = vmax.f32 %v110_v13, 0.0  ;;  %v127_v22 = vmax.f32 %v111_v14, 0.0 }
  0x15   :  { %v145_v23 = vpack.c.bf16 %v115_v16, %v114_v15  ;;  %v147_v24 = vpack.c.bf16 %v119_v10, %v118_v17 }
  0x16   :  { %221 = vmatpush.bf16.msra.mxu0 %v694_v25  ;;  %754 = vmatpush.bf16.msra.mxu1 %v694_v25  ;;  %v151_v26 = vpack.c.bf16 %v127_v22, %v126_v21 }
  0x17   :  { %755 = vmatpush.bf16.msra.mxu2 %v694_v25  ;;  %756 = vmatpush.bf16.msra.mxu3 %v694_v25  ;;  %v149_v25 = vpack.c.bf16 %v123_v19, %v122_v18 }
  0x1a   :  { %222 = vmatpush.bf16.msra.mxu0 %v693_v34  ;;  %757 = vmatpush.bf16.msra.mxu1 %v693_v34 }
  0x1b   :  { %758 = vmatpush.bf16.msra.mxu2 %v693_v34  ;;  %759 = vmatpush.bf16.msra.mxu3 %v693_v34 }
  0x1e   :  { %223 = vmatpush.bf16.msra.mxu0 %v692_v45  ;;  %760 = vmatpush.bf16.msra.mxu1 %v692_v45 }
  0x1f   :  { %761 = vmatpush.bf16.msra.mxu2 %v692_v45  ;;  %762 = vmatpush.bf16.msra.mxu3 %v692_v45 }
  0x21   :  { %224 = vmatmul.bf16.vlgmr.msra.gmra.mxu0 %v144_v50  ;;  %234 = vmatmul.bf16.vlgmr.msra.gmra.mxu1 %v146_v54 }
  0x22   :  { %244 = vmatmul.bf16.vlgmr.msra.gmra.mxu2 %v148_v55  ;;  %254 = vmatmul.bf16.vlgmr.msra.gmra.mxu3 %v150_v58 }
  0x31   :  { %229 = vmatmul.bf16.gmra.mxu0 %v145_v23  ;;  %239 = vmatmul.bf16.gmra.mxu1 %v147_v24 }
  0x32   :  { %249 = vmatmul.bf16.gmra.mxu2 %v149_v25  ;;  %259 = vmatmul.bf16.gmra.mxu3 %v151_v26 }
  0x9e   :  { %v225_v27 = vpop.f32.mrf.mxu0  ;;  %v235_v28 = vpop.f32.mrf.mxu1 }
  0x9f   :  { %v320_v29 = vadd.f32 %v953_v20, %v225_v27  ;;  %v324_v30 = vadd.f32 %v953_v20, %v235_v28 }
  0xa1   :  { %v336_v31 = vsub.f32 0.0, %v320_v29  ;;  %v340_v32 = vsub.f32 0.0, %v324_v30 }
  0xa3   :  { %v352_v33 = vmul.f32 1.442695, %v336_v31  ;;  %v360_v34 = vmul.f32 1.442695, %v340_v32 }
  0xa5   :  { %766 = vpow2.f32 %v352_v33  ;;  %v245_v35 = vpop.f32.mrf.mxu2  ;;  %v255_v36 = vpop.f32.mrf.mxu3 }
  0xa6   :  { %768 = vpow2.f32 %v360_v34  ;;  %v328_v37 = vadd.f32 %v953_v20, %v245_v35  ;;  %v332_v38 = vadd.f32 %v953_v20, %v255_v36  ;;  %v227_v39 = vpop.f32.mrf.mxu0  ;;  %v237_v40 = vpop.f32.mrf.mxu1 }
  0xa7   :  { %v321_v41 = vadd.f32 %v953_v20, %v227_v39  ;;  %v325_v42 = vadd.f32 %v953_v20, %v237_v40 }
  0xa8   :  { %v344_v43 = vsub.f32 0.0, %v328_v37  ;;  %v348_v44 = vsub.f32 0.0, %v332_v38 }
  0xa9   :  { %v337_v45 = vsub.f32 0.0, %v321_v41  ;;  %v341_v46 = vsub.f32 0.0, %v325_v42 }
  0xaa   :  { %v368_v47 = vmul.f32 1.442695, %v344_v43  ;;  %v376_v48 = vmul.f32 1.442695, %v348_v44 }
  0xab   :  { %v767_v49 = vpop.eup %766  ;;  %v354_v52 = vmul.f32 1.442695, %v337_v45  ;;  %v362_v54 = vmul.f32 1.442695, %v341_v46 }
  0xac   :  { %v769_v50 = vpop.eup %768  ;;  %v384_v51 = vadd.f32 1.0, %v767_v49  ;;  %770 = vpow2.f32 %v368_v47 }
  0xad   :  { %v961_v53 = vadd.f32 1.0, %v769_v50  ;;  %772 = vpow2.f32 %v376_v48  ;;  %v247_v55 = vpop.f32.mrf.mxu2  ;;  %v257_v57 = vpop.f32.mrf.mxu3 }
  0xae   :  { %774 = vrcp.f32 %v384_v51  ;;  %v329_v56 = vadd.f32 %v953_v20, %v247_v55  ;;  %v230_v58 = vpop.f32.mrf.mxu0  ;;  %v240_v59 = vpop.f32.mrf.mxu1  ;;  %v409_v61 = vand.u32 2147483647, %v384_v51  ;;  %v411_v62 = vand.u32 2147483648, %v384_v51 }
  0xaf   :  { %776 = vrcp.f32 %v961_v53  ;;  %v469_v1 = vand.u32 2147483647, %v961_v53  ;;  %v471_v2 = vand.u32 2147483648, %v961_v53  ;;  %v333_v6 = vadd.f32 %v953_v20, %v257_v57 }
  0xb0   :  { %778 = vpow2.f32 %v354_v52  ;;  %v345_v63 = vsub.f32 0.0, %v329_v56  ;;  %v973_v7 = vadd.f32 %v953_v20, %v230_v58  ;;  %v976_v8 = vadd.f32 %v953_v20, %v240_v59 }
  0xb1   :  { %780 = vpow2.f32 %v362_v54  ;;  %vm405_vm0 = vweird.f32 %v384_v51  ;;  %vm465_vm1 = vweird.f32 %v961_v53  ;;  %vm980_vm2 = vcmp.eq.f32.partialorder %v409_v61, 8.507059e+37 }
  0xb2   :  { %v771_v60 = vpop.eup %770  ;;  %v412_v14 = vor.u32 1.1754944e-38, %v411_v62  ;;  %v370_v16 = vmul.f32 1.442695, %v345_v63  ;;  %vm985_vm3 = vcmp.eq.f32.partialorder %v469_v1, 8.507059e+37  ;;  %v472_v19 = vor.u32 1.1754944e-38, %v471_v2 }
  0xb3   :  { %v773_v0 = vpop.eup %772  ;;  %v967_v3 = vadd.f32 1.0, %v771_v60  ;;  %v349_v22 = vsub.f32 0.0, %v333_v6  ;;  %v338_v23 = vsub.f32 0.0, %v973_v7  ;;  %v342_v24 = vsub.f32 0.0, %v976_v8 }
  0xb4   :  { %v775_v4 = vpop.eup %774  ;;  %v969_v5 = vadd.f32 1.0, %v773_v0 }
  0xb5   :  { %v777_v9 = vpop.eup %776  ;;  %v401_v11 = vmul.f32 %v775_v4, %v384_v51  ;;  %782 = vrcp.f32 %v967_v3  ;;  %vm406_vm4 = vweird.f32 %v775_v4  ;;  %v529_v29 = vand.u32 2147483647, %v967_v3  ;;  %v250_v6 = vpop.f32.mrf.mxu2 }
  0xb6   :  { %v779_v12 = vpop.eup %778  ;;  %v461_v15 = vmul.f32 %v777_v9, %v961_v53  ;;  %784 = vrcp.f32 %v969_v5  ;;  %vm466_vm5 = vweird.f32 %v777_v9  ;;  %v531_v32 = vand.u32 2147483648, %v967_v3  ;;  %vm407_vm6 = vmor %vm405_vm0, %vm406_vm4  ;;  %v260_v7 = vpop.f32.mrf.mxu3 }
  0xb7   :  { %v781_v17 = vpop.eup %780  ;;  %v402_v10 = vsub.f32 1.0, %v401_v11  ;;  %v992_v26 = vadd.f32 1.0, %v779_v12  ;;  %786 = vpow2.f32 %v370_v16  ;;  %v589_v33 = vand.u32 2147483647, %v969_v5  ;;  %vm467_vm8 = vmor %vm465_vm1, %vm466_vm5 }
  0xb8   :  { %v462_v21 = vsub.f32 1.0, %v461_v15  ;;  %v994_v27 = vadd.f32 1.0, %v781_v17  ;;  %vm525_vm7 = vweird.f32 %v967_v3  ;;  %v378_v36 = vmul.f32 1.442695, %v349_v22 }
  0xb9   :  { %v403_v25 = vmul.f32 %v775_v4, %v402_v10  ;;  %788 = vrcp.f32 %v992_v26  ;;  %vm585_vm9 = vweird.f32 %v969_v5  ;;  %v591_v39 = vand.u32 2147483648, %v969_v5 }
  0xba   :  { %v463_v28 = vmul.f32 %v777_v9, %v462_v21  ;;  %790 = vrcp.f32 %v994_v27  ;;  %vm1017_vm10 = vcmp.eq.f32.partialorder %v529_v29, 8.507059e+37  ;;  %v532_v46 = vor.u32 1.1754944e-38, %v531_v32 }
  0xbb   :  { %v783_v30 = vpop.eup %782  ;;  %v404_v31 = vadd.f32 %v775_v4, %v403_v25  ;;  %vm1021_vm11 = vcmp.eq.f32.partialorder %v589_v33, 8.507059e+37  ;;  %792 = vpow2.f32 %v378_v36  ;;  %v592_v52 = vor.u32 1.1754944e-38, %v591_v39 }
  0xbc   :  { %v464_v34 = vadd.f32 %v777_v9, %v463_v28  ;;  %v521_v35 = vmul.f32 %v783_v30, %v967_v3  ;;  %v785_v37 = vpop.eup %784  ;;  %vm526_vm12 = vweird.f32 %v783_v30  ;;  %vm420_vm14 = vweird.f32 %v992_v26 }
  0xbd   :  { %v408_v38 = vsel %vm407_vm6, %v775_v4, %v404_v31  ;;  %v581_v43 = vmul.f32 %v785_v37, %v969_v5  ;;  %v787_v48 = vpop.eup %786  ;;  %vm586_vm13 = vweird.f32 %v785_v37  ;;  %v356_v57 = vmul.f32 1.442695, %v338_v23  ;;  %vm527_vm15 = vmor %vm525_vm7, %vm526_vm12 }
  0xbe   :  { %v413_v40 = vsel %vm980_vm2, %v412_v14, %v408_v38  ;;  %v468_v41 = vsel %vm467_vm8, %v777_v9, %v464_v34  ;;  %v522_v42 = vsub.f32 1.0, %v521_v35  ;;  %v1029_v53 = vadd.f32 1.0, %v787_v48  ;;  %vm587_vm0 = vmor %vm585_vm9, %vm586_vm13 }
  0xbf   :  { %640 = vst [vmem:[%s1187_s5] sm:$0xff] %v413_v40  ;;  %v473_v44 = vsel %vm985_vm3, %v472_v19, %v468_v41  ;;  %v582_v50 = vsub.f32 1.0, %v581_v43  ;;  %v789_v51 = vpop.eup %788  ;;  %v424_v59 = vand.u32 2147483647, %v992_v26  ;;  %v426_v60 = vand.u32 2147483648, %v992_v26  ;;  %v232_v19 = vpop.f32.mrf.mxu0 }
  0xc0   :  { %644 = vst [vmem:[%s1187_s5 + $0x20] sm:$0xff] %v473_v44  ;;  %v523_v49 = vmul.f32 %v783_v30, %v522_v42  ;;  %v416_v56 = vmul.f32 %v789_v51, %v992_v26  ;;  %v791_v58 = vpop.eup %790  ;;  %794 = vrcp.f32 %v1029_v53  ;;  %v364_v61 = vmul.f32 1.442695, %v342_v24 }
  0xc1   :  { %v583_v55 = vmul.f32 %v785_v37, %v582_v50  ;;  %v476_v1 = vmul.f32 %v791_v58, %v994_v27  ;;  %vm421_vm1 = vweird.f32 %v789_v51  ;;  %v484_v3 = vand.u32 2147483647, %v994_v27  ;;  %v793_v8 = vpop.eup %792  ;;  %v252_v50 = vpop.f32.mrf.mxu2 }
  0xc2   :  { %v524_v54 = vadd.f32 %v783_v30, %v523_v49  ;;  %v417_v0 = vsub.f32 1.0, %v416_v56  ;;  %v486_v4 = vand.u32 2147483648, %v994_v27  ;;  %796 = vpow2.f32 %v356_v57  ;;  %vm422_vm3 = vmor %vm420_vm14, %vm421_vm1 }
  0xc3   :  { %v584_v63 = vadd.f32 %v785_v37, %v583_v55  ;;  %v477_v12 = vsub.f32 1.0, %v476_v1  ;;  %vm481_vm2 = vweird.f32 %v791_v58  ;;  %v1050_v13 = vadd.f32 1.0, %v793_v8 }
  0xc4   :  { %v528_v62 = vsel %vm527_vm15, %v783_v30, %v524_v54  ;;  %v418_v11 = vmul.f32 %v789_v51, %v417_v0  ;;  %798 = vpow2.f32 %v364_v61  ;;  %v330_v16 = vadd.f32 %v953_v20, %v250_v6  ;;  %v262_v54 = vpop.f32.mrf.mxu3 }
  0xc5   :  { %v533_v2 = vsel %vm1017_vm10, %v532_v46, %v528_v62  ;;  %v588_v9 = vsel %vm587_vm0, %v785_v37, %v584_v63  ;;  %v478_v15 = vmul.f32 %v791_v58, %v477_v12  ;;  %v334_v17 = vadd.f32 %v953_v20, %v260_v7  ;;  %v242_v37 = vpop.f32.mrf.mxu1 }
  0xc6   :  { %648 = vst [vmem:[%s1187_s5 + $0x40] sm:$0xff] %v533_v2  ;;  %v593_v5 = vsel %vm1021_vm11, %v592_v52, %v588_v9  ;;  %v419_v14 = vadd.f32 %v789_v51, %v418_v11  ;;  %v795_v10 = vpop.eup %794  ;;  %vm425_vm4 = vcmp.eq.f32.partialorder %v424_v59, 8.507059e+37  ;;  %v427_v18 = vor.u32 1.1754944e-38, %v426_v60 }
  0xc7   :  { %652 = vst [vmem:[%s1187_s5 + $0x60] sm:$0xff] %v593_v5  ;;  %vm480_vm5 = vweird.f32 %v994_v27  ;;  %800 = vrcp.f32 %v1050_v13  ;;  %v479_v22 = vadd.f32 %v791_v58, %v478_v15  ;;  %vm485_vm6 = vcmp.eq.f32.partialorder %v484_v3, 8.507059e+37 }
  0xc8   :  { %v423_v21 = vsel %vm422_vm3, %v789_v51, %v419_v14  ;;  %v536_v23 = vmul.f32 %v795_v10, %v1029_v53  ;;  %vm482_vm7 = vmor %vm480_vm5, %vm481_vm2  ;;  %v487_v25 = vor.u32 1.1754944e-38, %v486_v4  ;;  %vm540_vm8 = vweird.f32 %v1029_v53  ;;  %v797_v28 = vpop.eup %796 }
  0xc9   :  { %v428_v24 = vsel %vm425_vm4, %v427_v18, %v423_v21  ;;  %v346_v26 = vsub.f32 0.0, %v330_v16  ;;  %v483_v27 = vsel %vm482_vm7, %v791_v58, %v479_v22  ;;  %v350_v30 = vsub.f32 0.0, %v334_v17 }
  0xca   :  { %641 = vst [vmem:[%s1187_s5 + $0x8] sm:$0xff] %v428_v24  ;;  %v537_v29 = vsub.f32 1.0, %v536_v23  ;;  %v323_v31 = vadd.f32 %v953_v20, %v232_v19  ;;  %v799_v32 = vpop.eup %798  ;;  %v488_v33 = vsel %vm485_vm6, %v487_v25, %v483_v27  ;;  %v544_v34 = vand.u32 2147483647, %v1029_v53 }
  0xcb   :  { %v546_v35 = vand.u32 2147483648, %v1029_v53  ;;  %v1071_v36 = vadd.f32 1.0, %v797_v28  ;;  %645 = vst [vmem:[%s1187_s5 + $0x28] sm:$0xff] %v488_v33  ;;  %vm541_vm9 = vweird.f32 %v795_v10  ;;  %v1076_v39 = vadd.f32 1.0, %v799_v32 }
  0xcc   :  { %v538_v38 = vmul.f32 %v795_v10, %v537_v29  ;;  %v372_v40 = vmul.f32 1.442695, %v346_v26  ;;  %v604_v42 = vand.u32 2147483647, %v1050_v13  ;;  %v380_v43 = vmul.f32 1.442695, %v350_v30  ;;  %vm542_vm10 = vmor %vm540_vm8, %vm541_vm9 }
  0xcd   :  { %v801_v41 = vpop.eup %800  ;;  %802 = vrcp.f32 %v1071_v36  ;;  %v339_v44 = vsub.f32 0.0, %v323_v31  ;;  %v327_v47 = vadd.f32 %v953_v20, %v242_v37  ;;  %vm545_vm11 = vcmp.eq.f32.partialorder %v544_v34, 8.507059e+37 }
  0xce   :  { %v539_v45 = vadd.f32 %v795_v10, %v538_v38  ;;  %v596_v46 = vmul.f32 %v801_v41, %v1050_v13  ;;  %804 = vrcp.f32 %v1076_v39  ;;  %v547_v48 = vor.u32 1.1754944e-38, %v546_v35 }
  0xcf   :  { %v606_v49 = vand.u32 2147483648, %v1050_v13  ;;  %vm600_vm12 = vweird.f32 %v1050_v13  ;;  %806 = vpow2.f32 %v372_v40  ;;  %vm1087_vm13 = vcmp.eq.f32.partialorder %v604_v42, 8.507059e+37 }
  0xd0   :  { %v543_v51 = vsel %vm542_vm10, %v795_v10, %v539_v45  ;;  %v597_v52 = vsub.f32 1.0, %v596_v46  ;;  %808 = vpow2.f32 %v380_v43  ;;  %v358_v57 = vmul.f32 1.442695, %v339_v44 }
  0xd1   :  { %v548_v55 = vsel %vm545_vm11, %v547_v48, %v543_v51  ;;  %vm601_vm14 = vweird.f32 %v801_v41  ;;  %v343_v58 = vsub.f32 0.0, %v327_v47  ;;  %v331_v59 = vadd.f32 %v953_v20, %v252_v50 }
  0xd2   :  { %649 = vst [vmem:[%s1187_s5 + $0x48] sm:$0xff] %v548_v55  ;;  %v598_v53 = vmul.f32 %v801_v41, %v597_v52  ;;  %v607_v61 = vor.u32 1.1754944e-38, %v606_v49  ;;  %vm435_vm15 = vweird.f32 %v1071_v36  ;;  %810 = vpow2.f32 %v358_v57  ;;  %vm602_vm0 = vmor %vm600_vm12, %vm601_vm14 }
  0xd3   :  { %v803_v60 = vpop.eup %802  ;;  %v335_v62 = vadd.f32 %v953_v20, %v262_v54  ;;  %v439_v2 = vand.u32 2147483647, %v1071_v36  ;;  %v366_v3 = vmul.f32 1.442695, %v343_v58  ;;  %v441_v4 = vand.u32 2147483648, %v1071_v36 }
  0xd4   :  { %v805_v63 = vpop.eup %804  ;;  %v599_v0 = vadd.f32 %v801_v41, %v598_v53  ;;  %v431_v1 = vmul.f32 %v803_v60, %v1071_v36  ;;  %vm495_vm1 = vweird.f32 %v1076_v39  ;;  %v347_v7 = vsub.f32 0.0, %v331_v59 }
  0xd5   :  { %v491_v6 = vmul.f32 %v805_v63, %v1076_v39  ;;  %v807_v8 = vpop.eup %806  ;;  %v501_v11 = vand.u32 2147483648, %v1076_v39  ;;  %812 = vpow2.f32 %v366_v3  ;;  %v351_v15 = vsub.f32 0.0, %v335_v62 }
  0xd6   :  { %v603_v9 = vsel %vm602_vm0, %v801_v41, %v599_v0  ;;  %v432_v20 = vsub.f32 1.0, %v431_v1  ;;  %v809_v12 = vpop.eup %808  ;;  %v394_v13 = vadd.f32 1.0, %v807_v8  ;;  %vm436_vm2 = vweird.f32 %v803_v60 }
  0xd7   :  { %v608_v5 = vsel %vm1087_vm13, %v607_v61, %v603_v9  ;;  %v492_v14 = vsub.f32 1.0, %v491_v6  ;;  %v1110_v17 = vadd.f32 1.0, %v809_v12  ;;  %v374_v10 = vmul.f32 1.442695, %v347_v7  ;;  %vm437_vm4 = vmor %vm435_vm15, %vm436_vm2 }
  0xd8   :  { %653 = vst [vmem:[%s1187_s5 + $0x68] sm:$0xff] %v608_v5  ;;  %v433_v16 = vmul.f32 %v803_v60, %v432_v20  ;;  %v811_v18 = vpop.eup %810  ;;  %vm496_vm3 = vweird.f32 %v805_v63  ;;  %v499_v21 = vand.u32 2147483647, %v1076_v39  ;;  %814 = vrcp.f32 %v394_v13 }
  0xd9   :  { %v493_v19 = vmul.f32 %v805_v63, %v492_v14  ;;  %816 = vrcp.f32 %v1110_v17  ;;  %vm440_vm5 = vcmp.eq.f32.partialorder %v439_v2, 8.507059e+37  ;;  %v442_v23 = vor.u32 1.1754944e-38, %v441_v4  ;;  %vm497_vm6 = vmor %vm495_vm1, %vm496_vm3 }
  0xda   :  { %v434_v22 = vadd.f32 %v803_v60, %v433_v16  ;;  %v382_v25 = vmul.f32 1.442695, %v351_v15  ;;  %v502_v27 = vor.u32 1.1754944e-38, %v501_v11  ;;  %v1118_v29 = vadd.f32 1.0, %v811_v18 }
  0xdb   :  { %v494_v24 = vadd.f32 %v805_v63, %v493_v19  ;;  %v813_v26 = vpop.eup %812  ;;  %818 = vpow2.f32 %v374_v10  ;;  %vm500_vm7 = vcmp.eq.f32.partialorder %v499_v21, 8.507059e+37  ;;  %v559_v40 = vand.u32 2147483647, %v394_v13 }
  0xdc   :  { %v438_v28 = vsel %vm437_vm4, %v803_v60, %v434_v22  ;;  %820 = vrcp.f32 %v1118_v29  ;;  %v1127_v34 = vadd.f32 1.0, %v813_v26  ;;  %v561_v41 = vand.u32 2147483648, %v394_v13 }
  0xdd   :  { %v443_v30 = vsel %vm440_vm5, %v442_v23, %v438_v28  ;;  %v498_v31 = vsel %vm497_vm6, %v805_v63, %v494_v24  ;;  %822 = vpow2.f32 %v382_v25  ;;  %v619_v42 = vand.u32 2147483647, %v1110_v17 }
  0xde   :  { %642 = vst [vmem:[%s1187_s5 + $0x10] sm:$0xff] %v443_v30  ;;  %v503_v32 = vsel %vm500_vm7, %v502_v27, %v498_v31  ;;  %v815_v33 = vpop.eup %814  ;;  %824 = vrcp.f32 %v1127_v34  ;;  %v621_v44 = vand.u32 2147483648, %v1110_v17  ;;  %vm555_vm8 = vweird.f32 %v394_v13 }
  0xdf   :  { %646 = vst [vmem:[%s1187_s5 + $0x30] sm:$0xff] %v503_v32  ;;  %v817_v35 = vpop.eup %816  ;;  %v551_v36 = vmul.f32 %v815_v33, %v394_v13  ;;  %vm556_vm9 = vweird.f32 %v815_v33  ;;  %vm615_vm10 = vweird.f32 %v1110_v17  ;;  %vm560_vm12 = vcmp.eq.f32.partialorder %v559_v40, 8.507059e+37 }
  0xe0   :  { %v611_v37 = vmul.f32 %v817_v35, %v1110_v17  ;;  %vm616_vm11 = vweird.f32 %v817_v35  ;;  %v562_v52 = vor.u32 1.1754944e-38, %v561_v41  ;;  %vm1138_vm13 = vcmp.eq.f32.partialorder %v619_v42, 8.507059e+37  ;;  %vm557_vm14 = vmor %vm555_vm8, %vm556_vm9 }
  0xe1   :  { %v819_v38 = vpop.eup %818  ;;  %v552_v39 = vsub.f32 1.0, %v551_v36  ;;  %v622_v57 = vor.u32 1.1754944e-38, %v621_v44  ;;  %vm617_vm15 = vmor %vm615_vm10, %vm616_vm11  ;;  %v454_v60 = vand.u32 2147483647, %v1118_v29  ;;  %v456_v61 = vand.u32 2147483648, %v1118_v29 }
  0xe2   :  { %v612_v43 = vsub.f32 1.0, %v611_v37  ;;  %v1133_v45 = vadd.f32 1.0, %v819_v38  ;;  %v821_v46 = vpop.eup %820  ;;  %vm450_vm1 = vweird.f32 %v1118_v29  ;;  %v514_v7 = vand.u32 2147483647, %v1127_v34 }
  0xe3   :  { %v553_v47 = vmul.f32 %v815_v33, %v552_v39  ;;  %v823_v48 = vpop.eup %822  ;;  %v446_v50 = vmul.f32 %v821_v46, %v1118_v29  ;;  %vm451_vm0 = vweird.f32 %v821_v46  ;;  %v516_v8 = vand.u32 2147483648, %v1127_v34 }
  0xe4   :  { %v613_v49 = vmul.f32 %v817_v35, %v612_v43  ;;  %826 = vrcp.f32 %v1133_v45  ;;  %v825_v55 = vpop.eup %824  ;;  %v1142_v58 = vadd.f32 1.0, %v823_v48  ;;  %vm452_vm2 = vmor %vm450_vm1, %vm451_vm0  ;;  %v457_v9 = vor.u32 1.1754944e-38, %v456_v61 }
  0xe5   :  { %v554_v51 = vadd.f32 %v815_v33, %v553_v47  ;;  %v447_v53 = vsub.f32 1.0, %v446_v50  ;;  %v506_v62 = vmul.f32 %v825_v55, %v1127_v34  ;;  %vm511_vm3 = vweird.f32 %v825_v55 }
  0xe6   :  { %v614_v56 = vadd.f32 %v817_v35, %v613_v49  ;;  %828 = vrcp.f32 %v1142_v58  ;;  %vm455_vm4 = vcmp.eq.f32.partialorder %v454_v60, 8.507059e+37  ;;  %vm510_vm5 = vweird.f32 %v1127_v34 }
  0xe7   :  { %v558_v59 = vsel %vm557_vm14, %v815_v33, %v554_v51  ;;  %v448_v1 = vmul.f32 %v821_v46, %v447_v53  ;;  %v507_v3 = vsub.f32 1.0, %v506_v62  ;;  %vm512_vm6 = vmor %vm510_vm5, %vm511_vm3  ;;  %vm515_vm7 = vcmp.eq.f32.partialorder %v514_v7, 8.507059e+37 }
  0xe8   :  { %v563_v63 = vsel %vm560_vm12, %v562_v52, %v558_v59  ;;  %v618_v0 = vsel %vm617_vm15, %v817_v35, %v614_v56  ;;  %v517_v15 = vor.u32 1.1754944e-38, %v516_v8  ;;  %v576_v16 = vand.u32 2147483648, %v1133_v45 }
  0xe9   :  { %650 = vst [vmem:[%s1187_s5 + $0x50] sm:$0xff] %v563_v63  ;;  %v623_v2 = vsel %vm1138_vm13, %v622_v57, %v618_v0  ;;  %v449_v6 = vadd.f32 %v821_v46, %v448_v1  ;;  %v508_v20 = vmul.f32 %v825_v55, %v507_v3  ;;  %v574_v19 = vand.u32 2147483647, %v1133_v45 }
  0xea   :  { %v827_v4 = vpop.eup %826  ;;  %654 = vst [vmem:[%s1187_s5 + $0x70] sm:$0xff] %v623_v2  ;;  %vm570_vm9 = vweird.f32 %v1133_v45  ;;  %v577_v24 = vor.u32 1.1754944e-38, %v576_v16  ;;  %v636_v28 = vand.u32 2147483648, %v1142_v58  ;;  %v634_v30 = vand.u32 2147483647, %v1142_v58 }
  0xeb   :  { %v566_v11 = vmul.f32 %v827_v4, %v1133_v45  ;;  %v453_v12 = vsel %vm452_vm2, %v821_v46, %v449_v6  ;;  %v509_v14 = vadd.f32 %v825_v55, %v508_v20  ;;  %vm571_vm8 = vweird.f32 %v827_v4 }
  0xec   :  { %v458_v5 = vsel %vm455_vm4, %v457_v9, %v453_v12  ;;  %v829_v17 = vpop.eup %828  ;;  %vm572_vm10 = vmor %vm570_vm9, %vm571_vm8  ;;  %vm575_vm11 = vcmp.eq.f32.partialorder %v574_v19, 8.507059e+37  ;;  %vm630_vm13 = vweird.f32 %v1142_v58  ;;  %v637_v32 = vor.u32 1.1754944e-38, %v636_v28 }
  0xed   :  { %v567_v13 = vsub.f32 1.0, %v566_v11  ;;  %643 = vst [vmem:[%s1187_s5 + $0x18] sm:$0xff] %v458_v5  ;;  %v513_v10 = vsel %vm512_vm6, %v825_v55, %v509_v14  ;;  %v626_v22 = vmul.f32 %v829_v17, %v1142_v58  ;;  %vm631_vm12 = vweird.f32 %v829_v17 }
  0xee   :  { %v518_v21 = vsel %vm515_vm7, %v517_v15, %v513_v10  ;;  %vm632_vm14 = vmor %vm630_vm13, %vm631_vm12  ;;  %vm635_vm15 = vcmp.eq.f32.partialorder %v634_v30, 8.507059e+37 }
  0xef   :  { %v568_v18 = vmul.f32 %v827_v4, %v567_v13  ;;  %647 = vst [vmem:[%s1187_s5 + $0x38] sm:$0xff] %v518_v21  ;;  %v627_v25 = vsub.f32 1.0, %v626_v22 }
  0xf1   :  { %v569_v23 = vadd.f32 %v827_v4, %v568_v18  ;;  %v628_v29 = vmul.f32 %v829_v17, %v627_v25 }
  0xf3   :  { %v573_v26 = vsel %vm572_vm10, %v827_v4, %v569_v23  ;;  %v629_v31 = vadd.f32 %v829_v17, %v628_v29 }
  0xf4   :  { %v578_v27 = vsel %vm575_vm11, %v577_v24, %v573_v26 }
  0xf5   :  { %651 = vst [vmem:[%s1187_s5 + $0x58] sm:$0xff] %v578_v27  ;;  %v633_v33 = vsel %vm632_vm14, %v829_v17, %v629_v31 }
  0xf6   :  { %v638_v34 = vsel %vm635_vm15, %v637_v32, %v633_v33 }
  0xf7   :  { %655 = vst [vmem:[%s1187_s5 + $0x78] sm:$0xff] %v638_v34 }

</bundles_post_ra>
